<compile_context>
chip_gen: v5e
topology: v5e:2x2
jax: 0.10.0
libtpu: 0.0.40
codegen_flags: <defaults>
</compile_context>

<pallas_src>
import jax
import jax.numpy as jnp
from jax import lax
from jax.experimental import pallas as pl
from jax.experimental.pallas import tpu as pltpu

NEG_POS_RATIO = 3


def _multibox_kernel(conf_ref, loc_ref, gt_ref, labels_ref, out_ref):
    """One batch row per grid step.

    conf_ref   : (1, C, P)   logits, classes on sublanes, priors on lanes
    loc_ref    : (1, 4, P)   predicted box offsets
    gt_ref     : (1, 4, P)   ground-truth box offsets
    labels_ref : (1, 1, P)   int32 labels (-1 marks padded priors)
    out_ref    : (1, 8, 128) lane 0: cls_sum, lane 1: l1_sum, lane 2: num_pos
    """
    conf = conf_ref[0].astype(jnp.float32)        # (C, P)
    pred = loc_ref[0].astype(jnp.float32)         # (4, P)
    gt = gt_ref[0].astype(jnp.float32)            # (4, P)
    labels = labels_ref[0]                        # (1, P) int32
    C, P = conf.shape

    # ---- log-softmax over classes (short sublane reduction) -----------------
    m = jnp.max(conf, axis=0, keepdims=True)                              # (1, P)
    lse = jnp.log(jnp.sum(jnp.exp(conf - m), axis=0, keepdims=True))      # (1, P)
    # background loss = -log_softmax[class 0]; mathematically >= 0, clamp so
    # the int32 bit pattern stays an order-preserving (non-negative) sort key.
    bg_loss = jnp.maximum((m + lse) - conf[0:1, :], 0.0)                  # (1, P)
    # target-class log-prob via masked sublane select + reduce (no one-hot matmul)
    iota_c = lax.broadcasted_iota(jnp.int32, (C, P), 0)
    tgt_logit = jnp.sum(jnp.where(iota_c == labels, conf, 0.0),
                        axis=0, keepdims=True)                            # (1, P)
    tgt_logp = tgt_logit - m - lse                                        # (1, P)

    pos_mask = labels > 0                                                 # (1, P)
    neg_mask = labels == 0          # padded priors (label -1) are neither
    num_pos = jnp.sum(pos_mask.astype(jnp.int32))                         # scalar
    num_neg_avail = jnp.sum(neg_mask.astype(jnp.int32))                   # scalar
    # Number of negatives actually selected (clamp is equivalent to PyTorch's
    # mask union when num_neg exceeds the number of true negatives).
    k = jnp.minimum(num_pos * NEG_POS_RATIO, num_neg_avail)               # scalar

    # ---- hard negative mining: O(31 * P) radix threshold search --------------
    # Non-negative f32 bit patterns compare identically as int32, so the k-th
    # largest bg_loss among negatives is found bit-by-bit (31 count passes).
    key = pltpu.bitcast(bg_loss, jnp.int32)                               # (1, P)
    key = jnp.where(neg_mask, key, jnp.int32(-1))   # positives / pads excluded

    # Greedy MSB->LSB maximization of t subject to count(key >= t) >= k.
    # Static Python loop (fully unrolled, constant bit masks, no dynamic shifts).
    t_key = jnp.int32(0)
    for bit in range(30, -1, -1):
        cand = t_key | jnp.int32(1 << bit)
        cnt = jnp.sum((key >= cand).astype(jnp.int32))
        t_key = jnp.where(cnt >= k, cand, t_key)

    above = key > t_key                                                   # (1, P)
    count_above = jnp.sum(above.astype(jnp.int32))                        # scalar
    sum_above = jnp.sum(jnp.where(above, bg_loss, 0.0))                   # scalar
    # Value of the k-th largest negative bg_loss (0.0 fallback when k == 0).
    t_val = jnp.max(jnp.where(key == t_key, bg_loss, 0.0))                # scalar
    extra = jnp.where(k > 0,
                      (k - count_above).astype(jnp.float32) * t_val, 0.0)
    neg_cls_sum = sum_above + extra           # CE of selected negatives == bg_loss
    pos_cls_sum = jnp.sum(jnp.where(pos_mask, -tgt_logp, 0.0))
    cls_sum = pos_cls_sum + neg_cls_sum

    # ---- smooth L1 over positive priors (sum reduction) ----------------------
    d = pred - gt
    ad = jnp.abs(d)
    sl1 = jnp.where(ad < 1.0, 0.5 * d * d, ad - 0.5)                      # (4, P)
    l1_sum = jnp.sum(jnp.where(pos_mask, sl1, 0.0))

    # ---- single merged lane-dense (1, 8, 128) output block --------------------
    lane = lax.broadcasted_iota(jnp.int32, (1, 8, 128), 2)
    out_ref[...] = jnp.where(
        lane == 0, cls_sum,
        jnp.where(lane == 1, l1_sum,
                  jnp.where(lane == 2, num_pos.astype(jnp.float32), 0.0)))


@jax.jit
def multibox_loss(confidence, predicted_locations, labels, gt_locations):
    """confidence (B,P,C), predicted_locations (B,P,4), labels (B,P) int,
    gt_locations (B,P,4).  Returns (smooth_l1_loss/num_pos, cls_loss/num_pos)."""
    B, P, C = confidence.shape

    # Pad priors to a multiple of 128 with inert priors (label -1): they are
    # excluded from positives, negatives, the mining key set and the L1 sum.
    P_pad = ((P + 127) // 128) * 128
    if P_pad != P:
        padP = P_pad - P
        confidence = jnp.pad(confidence, ((0, 0), (0, padP), (0, 0)))
        predicted_locations = jnp.pad(predicted_locations, ((0, 0), (0, padP), (0, 0)))
        gt_locations = jnp.pad(gt_locations, ((0, 0), (0, padP), (0, 0)))
        labels = jnp.pad(labels, ((0, 0), (0, padP)), constant_values=-1)

    # Lane-dense layouts: priors on the last (lane) axis.  Native dtype is kept
    # (no f32 upcast) -> half the HBM->VMEM DMA bytes for bf16 inputs.
    # TODO(synk): push this layout change into the upstream producer so the
    # wrapper-side transposes (an extra HBM round trip) disappear entirely.
    conf_t = jnp.transpose(confidence, (0, 2, 1))            # (B, C, P_pad)
    pred_t = jnp.transpose(predicted_locations, (0, 2, 1))   # (B, 4, P_pad)
    gt_t = jnp.transpose(gt_locations, (0, 2, 1))            # (B, 4, P_pad)
    labels_t = labels.astype(jnp.int32).reshape(B, 1, P_pad) # (B, 1, P_pad)

    sums = pl.pallas_call(
        _multibox_kernel,
        out_shape=jax.ShapeDtypeStruct((B, 8, 128), jnp.float32),
        grid=(B,),
        in_specs=[
            pl.BlockSpec((1, C, P_pad), lambda b: (b, 0, 0)),
            pl.BlockSpec((1, 4, P_pad), lambda b: (b, 0, 0)),
            pl.BlockSpec((1, 4, P_pad), lambda b: (b, 0, 0)),
            pl.BlockSpec((1, 1, P_pad), lambda b: (b, 0, 0)),
        ],
        out_specs=pl.BlockSpec((1, 8, 128), lambda b: (b, 0, 0)),
        compiler_params=pltpu.CompilerParams(
            dimension_semantics=("parallel",),      # shard batch rows across TCs (v7x)
            vmem_limit_bytes=32 * 1024 * 1024,      # headroom inside v7x's 64 MiB VMEM
        ),
    )(conf_t, pred_t, gt_t, labels_t)

    cls_sum = jnp.sum(sums[:, 0, 0])
    l1_sum = jnp.sum(sums[:, 0, 1])
    num_pos = jnp.sum(sums[:, 0, 2])   # PyTorch also divides by 0 if no positives
    return l1_sum / num_pos, cls_sum / num_pos


def _reference(confidence, predicted_locations, labels, gt_locations):
    """Pure-JAX re-implementation of the PyTorch forward (reduction='mean' path)."""
    log_probs = jax.nn.log_softmax(confidence.astype(jnp.float32), axis=2)
    bg_loss = -log_probs[:, :, 0]
    pos_mask = labels > 0
    num_pos = jnp.sum(pos_mask, axis=1, keepdims=True).astype(jnp.int32)
    num_neg = num_pos * NEG_POS_RATIO
    neg_loss = jnp.where(pos_mask, -jnp.inf, bg_loss)
    # stable descending sort -> rank (matches hard_negative_mining's double argsort)
    indexes = jnp.argsort(-neg_loss, axis=1, stable=True)
    orders = jnp.argsort(indexes, axis=1, stable=True)
    neg_mask = orders < num_neg
    mask = pos_mask | neg_mask

    tgt_logp = jnp.take_along_axis(log_probs, labels[:, :, None], axis=2)[:, :, 0]
    cls_sum = jnp.sum(jnp.where(mask, -tgt_logp, 0.0))

    d = predicted_locations.astype(jnp.float32) - gt_locations.astype(jnp.float32)
    ad = jnp.abs(d)
    sl1 = jnp.where(ad < 1.0, 0.5 * d * d, ad - 0.5)
    l1_sum = jnp.sum(jnp.where(pos_mask[:, :, None], sl1, 0.0))

    n = jnp.sum(pos_mask).astype(jnp.float32)
    return l1_sum / n, cls_sum / n


if __name__ == "__main__":
    # Small shapes consistent with the module's forward signature.
    # P deliberately NOT a multiple of 128 to exercise the padding path.
    B, P, C = 2, 300, 8   # batch, num_priors, num_classes
    key = jax.random.PRNGKey(0)
    k1, k2, k3, k4 = jax.random.split(key, 4)

    confidence = jax.random.normal(k1, (B, P, C), dtype=jnp.float32)
    predicted_locations = jax.random.normal(k2, (B, P, 4), dtype=jnp.float32)
    gt_locations = jax.random.normal(k3, (B, P, 4), dtype=jnp.float32)
    # ~75% background (label 0), rest positive classes 1..C-1
    raw = jax.random.randint(k4, (B, P), 0, 4 * (C - 1), dtype=jnp.int32)
    labels = jnp.where(raw < 3 * (C - 1), 0, raw - 3 * (C - 1) + 1).astype(jnp.int32)

    l1_loss, cls_loss = multibox_loss(confidence, predicted_locations, labels, gt_locations)
    jax.block_until_ready((l1_loss, cls_loss))

    l1_ref, cls_ref = _reference(confidence, predicted_locations, labels, gt_locations)
    assert jnp.allclose(l1_loss, l1_ref, rtol=1e-5, atol=1e-5), (l1_loss, l1_ref)
    assert jnp.allclose(cls_loss, cls_ref, rtol=1e-5, atol=1e-5), (cls_loss, cls_ref)

    print("KERNEL_OK")
</pallas_src>

<mosaic_0001>
module attributes {stable_mosaic.version = 11 : i64} {
  func.func @_multibox_kernel(%arg0: i32, %arg1: memref<1x8x384xf32, #tpu.memory_space<vmem>>, %arg2: memref<1x4x384xf32, #tpu.memory_space<vmem>>, %arg3: memref<1x4x384xf32, #tpu.memory_space<vmem>>, %arg4: memref<1x1x384xi32, #tpu.memory_space<vmem>>, %arg5: memref<1x8x128xf32, #tpu.memory_space<vmem>>) attributes {dimension_semantics = [#tpu.dimension_semantics<parallel>], iteration_bounds = array<i64: 2>, scalar_prefetch = 0 : i64, scratch_operands = 0 : i64, tpu.core_type = #tpu.core_type<tc>, window_params = [{transform_indices = @transform_0, window_bounds = array<i64: 1, 8, 384>}, {transform_indices = @transform_1, window_bounds = array<i64: 1, 4, 384>}, {transform_indices = @transform_2, window_bounds = array<i64: 1, 4, 384>}, {transform_indices = @transform_3, window_bounds = array<i64: 1, 1, 384>}, {transform_indices = @transform_4, window_bounds = array<i64: 1, 8, 128>}]} {
    %c0 = arith.constant 0 : index
    %c0_0 = arith.constant 0 : index
    %c0_1 = arith.constant 0 : index
    %0 = vector.load %arg1[%c0, %c0_0, %c0_1] : memref<1x8x384xf32, #tpu.memory_space<vmem>>, vector<1x8x384xf32>
    %1 = vector.shape_cast %0 : vector<1x8x384xf32> to vector<8x384xf32>
    %c0_2 = arith.constant 0 : index
    %c0_3 = arith.constant 0 : index
    %c0_4 = arith.constant 0 : index
    %2 = vector.load %arg2[%c0_2, %c0_3, %c0_4] : memref<1x4x384xf32, #tpu.memory_space<vmem>>, vector<1x4x384xf32>
    %3 = vector.shape_cast %2 : vector<1x4x384xf32> to vector<4x384xf32>
    %c0_5 = arith.constant 0 : index
    %c0_6 = arith.constant 0 : index
    %c0_7 = arith.constant 0 : index
    %4 = vector.load %arg3[%c0_5, %c0_6, %c0_7] : memref<1x4x384xf32, #tpu.memory_space<vmem>>, vector<1x4x384xf32>
    %5 = vector.shape_cast %4 : vector<1x4x384xf32> to vector<4x384xf32>
    %c0_8 = arith.constant 0 : index
    %c0_9 = arith.constant 0 : index
    %c0_10 = arith.constant 0 : index
    %6 = vector.load %arg4[%c0_8, %c0_9, %c0_10] : memref<1x1x384xi32, #tpu.memory_space<vmem>>, vector<1x1x384xi32>
    %7 = vector.shape_cast %6 : vector<1x1x384xi32> to vector<1x384xi32>
    %cst = arith.constant dense<0xFF800000> : vector<384xf32>
    %8 = vector.multi_reduction <maximumf>, %1, %cst [0] : vector<8x384xf32> to vector<384xf32>
    %9 = vector.shape_cast %8 : vector<384xf32> to vector<1x384xf32>
    %10 = vector.broadcast %9 : vector<1x384xf32> to vector<8x384xf32>
    %11 = arith.subf %1, %10 : vector<8x384xf32>
    %12 = math.exp %11 : vector<8x384xf32>
    %cst_11 = arith.constant dense<0.000000e+00> : vector<384xf32>
    %13 = vector.multi_reduction <add>, %12, %cst_11 [0] : vector<8x384xf32> to vector<384xf32>
    %14 = vector.shape_cast %13 : vector<384xf32> to vector<1x384xf32>
    %15 = math.log %14 : vector<1x384xf32>
    %16 = arith.addf %9, %15 : vector<1x384xf32>
    %17 = vector.extract_strided_slice %1 {offsets = [0, 0], sizes = [1, 384], strides = [1, 1]} : vector<8x384xf32> to vector<1x384xf32>
    %18 = arith.subf %16, %17 : vector<1x384xf32>
    %cst_12 = arith.constant 0.000000e+00 : f32
    %19 = vector.broadcast %cst_12 : f32 to vector<1x384xf32>
    %20 = arith.maximumf %18, %19 : vector<1x384xf32>
    %21 = tpu.iota {dimensions = array<i32: 0>} : vector<8x384xi32>
    %22 = vector.broadcast %7 : vector<1x384xi32> to vector<8x384xi32>
    %23 = arith.cmpi eq, %21, %22 : vector<8x384xi32>
    %cst_13 = arith.constant 0.000000e+00 : f32
    %24 = vector.broadcast %cst_13 : f32 to vector<8x384xf32>
    %25 = arith.select %23, %1, %24 : vector<8x384xi1>, vector<8x384xf32>
    %cst_14 = arith.constant dense<0.000000e+00> : vector<384xf32>
    %26 = vector.multi_reduction <add>, %25, %cst_14 [0] : vector<8x384xf32> to vector<384xf32>
    %27 = vector.shape_cast %26 : vector<384xf32> to vector<1x384xf32>
    %28 = arith.subf %27, %9 : vector<1x384xf32>
    %29 = arith.subf %28, %15 : vector<1x384xf32>
    %c0_i32 = arith.constant 0 : i32
    %30 = vector.broadcast %c0_i32 : i32 to vector<1x384xi32>
    %31 = arith.cmpi sgt, %7, %30 : vector<1x384xi32>
    %c0_i32_15 = arith.constant 0 : i32
    %32 = vector.broadcast %c0_i32_15 : i32 to vector<1x384xi32>
    %33 = arith.cmpi eq, %7, %32 : vector<1x384xi32>
    %34 = arith.extui %31 : vector<1x384xi1> to vector<1x384xi32>
    %35 = vector.shape_cast %34 : vector<1x384xi32> to vector<1x1x384xi32>
    %cst_16 = arith.constant dense<0> : vector<1xi32>
    %36 = vector.multi_reduction <add>, %35, %cst_16 [1, 2] : vector<1x1x384xi32> to vector<1xi32>
    %37 = vector.shape_cast %36 : vector<1xi32> to vector<1x1x1xi32>
    %38 = vector.extract %37[0, 0, 0] : i32 from vector<1x1x1xi32>
    %39 = arith.extui %33 : vector<1x384xi1> to vector<1x384xi32>
    %40 = vector.shape_cast %39 : vector<1x384xi32> to vector<1x1x384xi32>
    %cst_17 = arith.constant dense<0> : vector<1xi32>
    %41 = vector.multi_reduction <add>, %40, %cst_17 [1, 2] : vector<1x1x384xi32> to vector<1xi32>
    %42 = vector.shape_cast %41 : vector<1xi32> to vector<1x1x1xi32>
    %43 = vector.extract %42[0, 0, 0] : i32 from vector<1x1x1xi32>
    %c3_i32 = arith.constant 3 : i32
    %44 = arith.muli %38, %c3_i32 : i32
    %45 = arith.minsi %44, %43 : i32
    %46 = tpu.bitcast %20 : vector<1x384xf32> -> vector<1x384xi32>
    %c-1_i32 = arith.constant -1 : i32
    %47 = vector.broadcast %c-1_i32 : i32 to vector<1x384xi32>
    %48 = arith.select %33, %46, %47 : vector<1x384xi1>, vector<1x384xi32>
    %c0_i32_18 = arith.constant 0 : i32
    %c1073741824_i32 = arith.constant 1073741824 : i32
    %49 = arith.ori %c0_i32_18, %c1073741824_i32 : i32
    %50 = vector.broadcast %49 : i32 to vector<1x384xi32>
    %51 = arith.cmpi sge, %48, %50 : vector<1x384xi32>
    %52 = arith.extui %51 : vector<1x384xi1> to vector<1x384xi32>
    %53 = vector.shape_cast %52 : vector<1x384xi32> to vector<1x1x384xi32>
    %cst_19 = arith.constant dense<0> : vector<1xi32>
    %54 = vector.multi_reduction <add>, %53, %cst_19 [1, 2] : vector<1x1x384xi32> to vector<1xi32>
    %55 = vector.shape_cast %54 : vector<1xi32> to vector<1x1x1xi32>
    %56 = vector.extract %55[0, 0, 0] : i32 from vector<1x1x1xi32>
    %57 = arith.cmpi sge, %56, %45 : i32
    %c0_i32_20 = arith.constant 0 : i32
    %58 = arith.select %57, %49, %c0_i32_20 : i32
    %c536870912_i32 = arith.constant 536870912 : i32
    %59 = arith.ori %58, %c536870912_i32 : i32
    %60 = vector.broadcast %59 : i32 to vector<1x384xi32>
    %61 = arith.cmpi sge, %48, %60 : vector<1x384xi32>
    %62 = arith.extui %61 : vector<1x384xi1> to vector<1x384xi32>
    %63 = vector.shape_cast %62 : vector<1x384xi32> to vector<1x1x384xi32>
    %cst_21 = arith.constant dense<0> : vector<1xi32>
    %64 = vector.multi_reduction <add>, %63, %cst_21 [1, 2] : vector<1x1x384xi32> to vector<1xi32>
    %65 = vector.shape_cast %64 : vector<1xi32> to vector<1x1x1xi32>
    %66 = vector.extract %65[0, 0, 0] : i32 from vector<1x1x1xi32>
    %67 = arith.cmpi sge, %66, %45 : i32
    %68 = arith.select %67, %59, %58 : i32
    %c268435456_i32 = arith.constant 268435456 : i32
    %69 = arith.ori %68, %c268435456_i32 : i32
    %70 = vector.broadcast %69 : i32 to vector<1x384xi32>
    %71 = arith.cmpi sge, %48, %70 : vector<1x384xi32>
    %72 = arith.extui %71 : vector<1x384xi1> to vector<1x384xi32>
    %73 = vector.shape_cast %72 : vector<1x384xi32> to vector<1x1x384xi32>
    %cst_22 = arith.constant dense<0> : vector<1xi32>
    %74 = vector.multi_reduction <add>, %73, %cst_22 [1, 2] : vector<1x1x384xi32> to vector<1xi32>
    %75 = vector.shape_cast %74 : vector<1xi32> to vector<1x1x1xi32>
    %76 = vector.extract %75[0, 0, 0] : i32 from vector<1x1x1xi32>
    %77 = arith.cmpi sge, %76, %45 : i32
    %78 = arith.select %77, %69, %68 : i32
    %c134217728_i32 = arith.constant 134217728 : i32
    %79 = arith.ori %78, %c134217728_i32 : i32
    %80 = vector.broadcast %79 : i32 to vector<1x384xi32>
    %81 = arith.cmpi sge, %48, %80 : vector<1x384xi32>
    %82 = arith.extui %81 : vector<1x384xi1> to vector<1x384xi32>
    %83 = vector.shape_cast %82 : vector<1x384xi32> to vector<1x1x384xi32>
    %cst_23 = arith.constant dense<0> : vector<1xi32>
    %84 = vector.multi_reduction <add>, %83, %cst_23 [1, 2] : vector<1x1x384xi32> to vector<1xi32>
    %85 = vector.shape_cast %84 : vector<1xi32> to vector<1x1x1xi32>
    %86 = vector.extract %85[0, 0, 0] : i32 from vector<1x1x1xi32>
    %87 = arith.cmpi sge, %86, %45 : i32
    %88 = arith.select %87, %79, %78 : i32
    %c67108864_i32 = arith.constant 67108864 : i32
    %89 = arith.ori %88, %c67108864_i32 : i32
    %90 = vector.broadcast %89 : i32 to vector<1x384xi32>
    %91 = arith.cmpi sge, %48, %90 : vector<1x384xi32>
    %92 = arith.extui %91 : vector<1x384xi1> to vector<1x384xi32>
    %93 = vector.shape_cast %92 : vector<1x384xi32> to vector<1x1x384xi32>
    %cst_24 = arith.constant dense<0> : vector<1xi32>
    %94 = vector.multi_reduction <add>, %93, %cst_24 [1, 2] : vector<1x1x384xi32> to vector<1xi32>
    %95 = vector.shape_cast %94 : vector<1xi32> to vector<1x1x1xi32>
    %96 = vector.extract %95[0, 0, 0] : i32 from vector<1x1x1xi32>
    %97 = arith.cmpi sge, %96, %45 : i32
    %98 = arith.select %97, %89, %88 : i32
    %c33554432_i32 = arith.constant 33554432 : i32
    %99 = arith.ori %98, %c33554432_i32 : i32
    %100 = vector.broadcast %99 : i32 to vector<1x384xi32>
    %101 = arith.cmpi sge, %48, %100 : vector<1x384xi32>
    %102 = arith.extui %101 : vector<1x384xi1> to vector<1x384xi32>
    %103 = vector.shape_cast %102 : vector<1x384xi32> to vector<1x1x384xi32>
    %cst_25 = arith.constant dense<0> : vector<1xi32>
    %104 = vector.multi_reduction <add>, %103, %cst_25 [1, 2] : vector<1x1x384xi32> to vector<1xi32>
    %105 = vector.shape_cast %104 : vector<1xi32> to vector<1x1x1xi32>
    %106 = vector.extract %105[0, 0, 0] : i32 from vector<1x1x1xi32>
    %107 = arith.cmpi sge, %106, %45 : i32
    %108 = arith.select %107, %99, %98 : i32
    %c16777216_i32 = arith.constant 16777216 : i32
    %109 = arith.ori %108, %c16777216_i32 : i32
    %110 = vector.broadcast %109 : i32 to vector<1x384xi32>
    %111 = arith.cmpi sge, %48, %110 : vector<1x384xi32>
    %112 = arith.extui %111 : vector<1x384xi1> to vector<1x384xi32>
    %113 = vector.shape_cast %112 : vector<1x384xi32> to vector<1x1x384xi32>
    %cst_26 = arith.constant dense<0> : vector<1xi32>
    %114 = vector.multi_reduction <add>, %113, %cst_26 [1, 2] : vector<1x1x384xi32> to vector<1xi32>
    %115 = vector.shape_cast %114 : vector<1xi32> to vector<1x1x1xi32>
    %116 = vector.extract %115[0, 0, 0] : i32 from vector<1x1x1xi32>
    %117 = arith.cmpi sge, %116, %45 : i32
    %118 = arith.select %117, %109, %108 : i32
    %c8388608_i32 = arith.constant 8388608 : i32
    %119 = arith.ori %118, %c8388608_i32 : i32
    %120 = vector.broadcast %119 : i32 to vector<1x384xi32>
    %121 = arith.cmpi sge, %48, %120 : vector<1x384xi32>
    %122 = arith.extui %121 : vector<1x384xi1> to vector<1x384xi32>
    %123 = vector.shape_cast %122 : vector<1x384xi32> to vector<1x1x384xi32>
    %cst_27 = arith.constant dense<0> : vector<1xi32>
    %124 = vector.multi_reduction <add>, %123, %cst_27 [1, 2] : vector<1x1x384xi32> to vector<1xi32>
    %125 = vector.shape_cast %124 : vector<1xi32> to vector<1x1x1xi32>
    %126 = vector.extract %125[0, 0, 0] : i32 from vector<1x1x1xi32>
    %127 = arith.cmpi sge, %126, %45 : i32
    %128 = arith.select %127, %119, %118 : i32
    %c4194304_i32 = arith.constant 4194304 : i32
    %129 = arith.ori %128, %c4194304_i32 : i32
    %130 = vector.broadcast %129 : i32 to vector<1x384xi32>
    %131 = arith.cmpi sge, %48, %130 : vector<1x384xi32>
    %132 = arith.extui %131 : vector<1x384xi1> to vector<1x384xi32>
    %133 = vector.shape_cast %132 : vector<1x384xi32> to vector<1x1x384xi32>
    %cst_28 = arith.constant dense<0> : vector<1xi32>
    %134 = vector.multi_reduction <add>, %133, %cst_28 [1, 2] : vector<1x1x384xi32> to vector<1xi32>
    %135 = vector.shape_cast %134 : vector<1xi32> to vector<1x1x1xi32>
    %136 = vector.extract %135[0, 0, 0] : i32 from vector<1x1x1xi32>
    %137 = arith.cmpi sge, %136, %45 : i32
    %138 = arith.select %137, %129, %128 : i32
    %c2097152_i32 = arith.constant 2097152 : i32
    %139 = arith.ori %138, %c2097152_i32 : i32
    %140 = vector.broadcast %139 : i32 to vector<1x384xi32>
    %141 = arith.cmpi sge, %48, %140 : vector<1x384xi32>
    %142 = arith.extui %141 : vector<1x384xi1> to vector<1x384xi32>
    %143 = vector.shape_cast %142 : vector<1x384xi32> to vector<1x1x384xi32>
    %cst_29 = arith.constant dense<0> : vector<1xi32>
    %144 = vector.multi_reduction <add>, %143, %cst_29 [1, 2] : vector<1x1x384xi32> to vector<1xi32>
    %145 = vector.shape_cast %144 : vector<1xi32> to vector<1x1x1xi32>
    %146 = vector.extract %145[0, 0, 0] : i32 from vector<1x1x1xi32>
    %147 = arith.cmpi sge, %146, %45 : i32
    %148 = arith.select %147, %139, %138 : i32
    %c1048576_i32 = arith.constant 1048576 : i32
    %149 = arith.ori %148, %c1048576_i32 : i32
    %150 = vector.broadcast %149 : i32 to vector<1x384xi32>
    %151 = arith.cmpi sge, %48, %150 : vector<1x384xi32>
    %152 = arith.extui %151 : vector<1x384xi1> to vector<1x384xi32>
    %153 = vector.shape_cast %152 : vector<1x384xi32> to vector<1x1x384xi32>
    %cst_30 = arith.constant dense<0> : vector<1xi32>
    %154 = vector.multi_reduction <add>, %153, %cst_30 [1, 2] : vector<1x1x384xi32> to vector<1xi32>
    %155 = vector.shape_cast %154 : vector<1xi32> to vector<1x1x1xi32>
    %156 = vector.extract %155[0, 0, 0] : i32 from vector<1x1x1xi32>
    %157 = arith.cmpi sge, %156, %45 : i32
    %158 = arith.select %157, %149, %148 : i32
    %c524288_i32 = arith.constant 524288 : i32
    %159 = arith.ori %158, %c524288_i32 : i32
    %160 = vector.broadcast %159 : i32 to vector<1x384xi32>
    %161 = arith.cmpi sge, %48, %160 : vector<1x384xi32>
    %162 = arith.extui %161 : vector<1x384xi1> to vector<1x384xi32>
    %163 = vector.shape_cast %162 : vector<1x384xi32> to vector<1x1x384xi32>
    %cst_31 = arith.constant dense<0> : vector<1xi32>
    %164 = vector.multi_reduction <add>, %163, %cst_31 [1, 2] : vector<1x1x384xi32> to vector<1xi32>
    %165 = vector.shape_cast %164 : vector<1xi32> to vector<1x1x1xi32>
    %166 = vector.extract %165[0, 0, 0] : i32 from vector<1x1x1xi32>
    %167 = arith.cmpi sge, %166, %45 : i32
    %168 = arith.select %167, %159, %158 : i32
    %c262144_i32 = arith.constant 262144 : i32
    %169 = arith.ori %168, %c262144_i32 : i32
    %170 = vector.broadcast %169 : i32 to vector<1x384xi32>
    %171 = arith.cmpi sge, %48, %170 : vector<1x384xi32>
    %172 = arith.extui %171 : vector<1x384xi1> to vector<1x384xi32>
    %173 = vector.shape_cast %172 : vector<1x384xi32> to vector<1x1x384xi32>
    %cst_32 = arith.constant dense<0> : vector<1xi32>
    %174 = vector.multi_reduction <add>, %173, %cst_32 [1, 2] : vector<1x1x384xi32> to vector<1xi32>
    %175 = vector.shape_cast %174 : vector<1xi32> to vector<1x1x1xi32>
    %176 = vector.extract %175[0, 0, 0] : i32 from vector<1x1x1xi32>
    %177 = arith.cmpi sge, %176, %45 : i32
    %178 = arith.select %177, %169, %168 : i32
    %c131072_i32 = arith.constant 131072 : i32
    %179 = arith.ori %178, %c131072_i32 : i32
    %180 = vector.broadcast %179 : i32 to vector<1x384xi32>
    %181 = arith.cmpi sge, %48, %180 : vector<1x384xi32>
    %182 = arith.extui %181 : vector<1x384xi1> to vector<1x384xi32>
    %183 = vector.shape_cast %182 : vector<1x384xi32> to vector<1x1x384xi32>
    %cst_33 = arith.constant dense<0> : vector<1xi32>
    %184 = vector.multi_reduction <add>, %183, %cst_33 [1, 2] : vector<1x1x384xi32> to vector<1xi32>
    %185 = vector.shape_cast %184 : vector<1xi32> to vector<1x1x1xi32>
    %186 = vector.extract %185[0, 0, 0] : i32 from vector<1x1x1xi32>
    %187 = arith.cmpi sge, %186, %45 : i32
    %188 = arith.select %187, %179, %178 : i32
    %c65536_i32 = arith.constant 65536 : i32
    %189 = arith.ori %188, %c65536_i32 : i32
    %190 = vector.broadcast %189 : i32 to vector<1x384xi32>
    %191 = arith.cmpi sge, %48, %190 : vector<1x384xi32>
    %192 = arith.extui %191 : vector<1x384xi1> to vector<1x384xi32>
    %193 = vector.shape_cast %192 : vector<1x384xi32> to vector<1x1x384xi32>
    %cst_34 = arith.constant dense<0> : vector<1xi32>
    %194 = vector.multi_reduction <add>, %193, %cst_34 [1, 2] : vector<1x1x384xi32> to vector<1xi32>
    %195 = vector.shape_cast %194 : vector<1xi32> to vector<1x1x1xi32>
    %196 = vector.extract %195[0, 0, 0] : i32 from vector<1x1x1xi32>
    %197 = arith.cmpi sge, %196, %45 : i32
    %198 = arith.select %197, %189, %188 : i32
    %c32768_i32 = arith.constant 32768 : i32
    %199 = arith.ori %198, %c32768_i32 : i32
    %200 = vector.broadcast %199 : i32 to vector<1x384xi32>
    %201 = arith.cmpi sge, %48, %200 : vector<1x384xi32>
    %202 = arith.extui %201 : vector<1x384xi1> to vector<1x384xi32>
    %203 = vector.shape_cast %202 : vector<1x384xi32> to vector<1x1x384xi32>
    %cst_35 = arith.constant dense<0> : vector<1xi32>
    %204 = vector.multi_reduction <add>, %203, %cst_35 [1, 2] : vector<1x1x384xi32> to vector<1xi32>
    %205 = vector.shape_cast %204 : vector<1xi32> to vector<1x1x1xi32>
    %206 = vector.extract %205[0, 0, 0] : i32 from vector<1x1x1xi32>
    %207 = arith.cmpi sge, %206, %45 : i32
    %208 = arith.select %207, %199, %198 : i32
    %c16384_i32 = arith.constant 16384 : i32
    %209 = arith.ori %208, %c16384_i32 : i32
    %210 = vector.broadcast %209 : i32 to vector<1x384xi32>
    %211 = arith.cmpi sge, %48, %210 : vector<1x384xi32>
    %212 = arith.extui %211 : vector<1x384xi1> to vector<1x384xi32>
    %213 = vector.shape_cast %212 : vector<1x384xi32> to vector<1x1x384xi32>
    %cst_36 = arith.constant dense<0> : vector<1xi32>
    %214 = vector.multi_reduction <add>, %213, %cst_36 [1, 2] : vector<1x1x384xi32> to vector<1xi32>
    %215 = vector.shape_cast %214 : vector<1xi32> to vector<1x1x1xi32>
    %216 = vector.extract %215[0, 0, 0] : i32 from vector<1x1x1xi32>
    %217 = arith.cmpi sge, %216, %45 : i32
    %218 = arith.select %217, %209, %208 : i32
    %c8192_i32 = arith.constant 8192 : i32
    %219 = arith.ori %218, %c8192_i32 : i32
    %220 = vector.broadcast %219 : i32 to vector<1x384xi32>
    %221 = arith.cmpi sge, %48, %220 : vector<1x384xi32>
    %222 = arith.extui %221 : vector<1x384xi1> to vector<1x384xi32>
    %223 = vector.shape_cast %222 : vector<1x384xi32> to vector<1x1x384xi32>
    %cst_37 = arith.constant dense<0> : vector<1xi32>
    %224 = vector.multi_reduction <add>, %223, %cst_37 [1, 2] : vector<1x1x384xi32> to vector<1xi32>
    %225 = vector.shape_cast %224 : vector<1xi32> to vector<1x1x1xi32>
    %226 = vector.extract %225[0, 0, 0] : i32 from vector<1x1x1xi32>
    %227 = arith.cmpi sge, %226, %45 : i32
    %228 = arith.select %227, %219, %218 : i32
    %c4096_i32 = arith.constant 4096 : i32
    %229 = arith.ori %228, %c4096_i32 : i32
    %230 = vector.broadcast %229 : i32 to vector<1x384xi32>
    %231 = arith.cmpi sge, %48, %230 : vector<1x384xi32>
    %232 = arith.extui %231 : vector<1x384xi1> to vector<1x384xi32>
    %233 = vector.shape_cast %232 : vector<1x384xi32> to vector<1x1x384xi32>
    %cst_38 = arith.constant dense<0> : vector<1xi32>
    %234 = vector.multi_reduction <add>, %233, %cst_38 [1, 2] : vector<1x1x384xi32> to vector<1xi32>
    %235 = vector.shape_cast %234 : vector<1xi32> to vector<1x1x1xi32>
    %236 = vector.extract %235[0, 0, 0] : i32 from vector<1x1x1xi32>
    %237 = arith.cmpi sge, %236, %45 : i32
    %238 = arith.select %237, %229, %228 : i32
    %c2048_i32 = arith.constant 2048 : i32
    %239 = arith.ori %238, %c2048_i32 : i32
    %240 = vector.broadcast %239 : i32 to vector<1x384xi32>
    %241 = arith.cmpi sge, %48, %240 : vector<1x384xi32>
    %242 = arith.extui %241 : vector<1x384xi1> to vector<1x384xi32>
    %243 = vector.shape_cast %242 : vector<1x384xi32> to vector<1x1x384xi32>
    %cst_39 = arith.constant dense<0> : vector<1xi32>
    %244 = vector.multi_reduction <add>, %243, %cst_39 [1, 2] : vector<1x1x384xi32> to vector<1xi32>
    %245 = vector.shape_cast %244 : vector<1xi32> to vector<1x1x1xi32>
    %246 = vector.extract %245[0, 0, 0] : i32 from vector<1x1x1xi32>
    %247 = arith.cmpi sge, %246, %45 : i32
    %248 = arith.select %247, %239, %238 : i32
    %c1024_i32 = arith.constant 1024 : i32
    %249 = arith.ori %248, %c1024_i32 : i32
    %250 = vector.broadcast %249 : i32 to vector<1x384xi32>
    %251 = arith.cmpi sge, %48, %250 : vector<1x384xi32>
    %252 = arith.extui %251 : vector<1x384xi1> to vector<1x384xi32>
    %253 = vector.shape_cast %252 : vector<1x384xi32> to vector<1x1x384xi32>
    %cst_40 = arith.constant dense<0> : vector<1xi32>
    %254 = vector.multi_reduction <add>, %253, %cst_40 [1, 2] : vector<1x1x384xi32> to vector<1xi32>
    %255 = vector.shape_cast %254 : vector<1xi32> to vector<1x1x1xi32>
    %256 = vector.extract %255[0, 0, 0] : i32 from vector<1x1x1xi32>
    %257 = arith.cmpi sge, %256, %45 : i32
    %258 = arith.select %257, %249, %248 : i32
    %c512_i32 = arith.constant 512 : i32
    %259 = arith.ori %258, %c512_i32 : i32
    %260 = vector.broadcast %259 : i32 to vector<1x384xi32>
    %261 = arith.cmpi sge, %48, %260 : vector<1x384xi32>
    %262 = arith.extui %261 : vector<1x384xi1> to vector<1x384xi32>
    %263 = vector.shape_cast %262 : vector<1x384xi32> to vector<1x1x384xi32>
    %cst_41 = arith.constant dense<0> : vector<1xi32>
    %264 = vector.multi_reduction <add>, %263, %cst_41 [1, 2] : vector<1x1x384xi32> to vector<1xi32>
    %265 = vector.shape_cast %264 : vector<1xi32> to vector<1x1x1xi32>
    %266 = vector.extract %265[0, 0, 0] : i32 from vector<1x1x1xi32>
    %267 = arith.cmpi sge, %266, %45 : i32
    %268 = arith.select %267, %259, %258 : i32
    %c256_i32 = arith.constant 256 : i32
    %269 = arith.ori %268, %c256_i32 : i32
    %270 = vector.broadcast %269 : i32 to vector<1x384xi32>
    %271 = arith.cmpi sge, %48, %270 : vector<1x384xi32>
    %272 = arith.extui %271 : vector<1x384xi1> to vector<1x384xi32>
    %273 = vector.shape_cast %272 : vector<1x384xi32> to vector<1x1x384xi32>
    %cst_42 = arith.constant dense<0> : vector<1xi32>
    %274 = vector.multi_reduction <add>, %273, %cst_42 [1, 2] : vector<1x1x384xi32> to vector<1xi32>
    %275 = vector.shape_cast %274 : vector<1xi32> to vector<1x1x1xi32>
    %276 = vector.extract %275[0, 0, 0] : i32 from vector<1x1x1xi32>
    %277 = arith.cmpi sge, %276, %45 : i32
    %278 = arith.select %277, %269, %268 : i32
    %c128_i32 = arith.constant 128 : i32
    %279 = arith.ori %278, %c128_i32 : i32
    %280 = vector.broadcast %279 : i32 to vector<1x384xi32>
    %281 = arith.cmpi sge, %48, %280 : vector<1x384xi32>
    %282 = arith.extui %281 : vector<1x384xi1> to vector<1x384xi32>
    %283 = vector.shape_cast %282 : vector<1x384xi32> to vector<1x1x384xi32>
    %cst_43 = arith.constant dense<0> : vector<1xi32>
    %284 = vector.multi_reduction <add>, %283, %cst_43 [1, 2] : vector<1x1x384xi32> to vector<1xi32>
    %285 = vector.shape_cast %284 : vector<1xi32> to vector<1x1x1xi32>
    %286 = vector.extract %285[0, 0, 0] : i32 from vector<1x1x1xi32>
    %287 = arith.cmpi sge, %286, %45 : i32
    %288 = arith.select %287, %279, %278 : i32
    %c64_i32 = arith.constant 64 : i32
    %289 = arith.ori %288, %c64_i32 : i32
    %290 = vector.broadcast %289 : i32 to vector<1x384xi32>
    %291 = arith.cmpi sge, %48, %290 : vector<1x384xi32>
    %292 = arith.extui %291 : vector<1x384xi1> to vector<1x384xi32>
    %293 = vector.shape_cast %292 : vector<1x384xi32> to vector<1x1x384xi32>
    %cst_44 = arith.constant dense<0> : vector<1xi32>
    %294 = vector.multi_reduction <add>, %293, %cst_44 [1, 2] : vector<1x1x384xi32> to vector<1xi32>
    %295 = vector.shape_cast %294 : vector<1xi32> to vector<1x1x1xi32>
    %296 = vector.extract %295[0, 0, 0] : i32 from vector<1x1x1xi32>
    %297 = arith.cmpi sge, %296, %45 : i32
    %298 = arith.select %297, %289, %288 : i32
    %c32_i32 = arith.constant 32 : i32
    %299 = arith.ori %298, %c32_i32 : i32
    %300 = vector.broadcast %299 : i32 to vector<1x384xi32>
    %301 = arith.cmpi sge, %48, %300 : vector<1x384xi32>
    %302 = arith.extui %301 : vector<1x384xi1> to vector<1x384xi32>
    %303 = vector.shape_cast %302 : vector<1x384xi32> to vector<1x1x384xi32>
    %cst_45 = arith.constant dense<0> : vector<1xi32>
    %304 = vector.multi_reduction <add>, %303, %cst_45 [1, 2] : vector<1x1x384xi32> to vector<1xi32>
    %305 = vector.shape_cast %304 : vector<1xi32> to vector<1x1x1xi32>
    %306 = vector.extract %305[0, 0, 0] : i32 from vector<1x1x1xi32>
    %307 = arith.cmpi sge, %306, %45 : i32
    %308 = arith.select %307, %299, %298 : i32
    %c16_i32 = arith.constant 16 : i32
    %309 = arith.ori %308, %c16_i32 : i32
    %310 = vector.broadcast %309 : i32 to vector<1x384xi32>
    %311 = arith.cmpi sge, %48, %310 : vector<1x384xi32>
    %312 = arith.extui %311 : vector<1x384xi1> to vector<1x384xi32>
    %313 = vector.shape_cast %312 : vector<1x384xi32> to vector<1x1x384xi32>
    %cst_46 = arith.constant dense<0> : vector<1xi32>
    %314 = vector.multi_reduction <add>, %313, %cst_46 [1, 2] : vector<1x1x384xi32> to vector<1xi32>
    %315 = vector.shape_cast %314 : vector<1xi32> to vector<1x1x1xi32>
    %316 = vector.extract %315[0, 0, 0] : i32 from vector<1x1x1xi32>
    %317 = arith.cmpi sge, %316, %45 : i32
    %318 = arith.select %317, %309, %308 : i32
    %c8_i32 = arith.constant 8 : i32
    %319 = arith.ori %318, %c8_i32 : i32
    %320 = vector.broadcast %319 : i32 to vector<1x384xi32>
    %321 = arith.cmpi sge, %48, %320 : vector<1x384xi32>
    %322 = arith.extui %321 : vector<1x384xi1> to vector<1x384xi32>
    %323 = vector.shape_cast %322 : vector<1x384xi32> to vector<1x1x384xi32>
    %cst_47 = arith.constant dense<0> : vector<1xi32>
    %324 = vector.multi_reduction <add>, %323, %cst_47 [1, 2] : vector<1x1x384xi32> to vector<1xi32>
    %325 = vector.shape_cast %324 : vector<1xi32> to vector<1x1x1xi32>
    %326 = vector.extract %325[0, 0, 0] : i32 from vector<1x1x1xi32>
    %327 = arith.cmpi sge, %326, %45 : i32
    %328 = arith.select %327, %319, %318 : i32
    %c4_i32 = arith.constant 4 : i32
    %329 = arith.ori %328, %c4_i32 : i32
    %330 = vector.broadcast %329 : i32 to vector<1x384xi32>
    %331 = arith.cmpi sge, %48, %330 : vector<1x384xi32>
    %332 = arith.extui %331 : vector<1x384xi1> to vector<1x384xi32>
    %333 = vector.shape_cast %332 : vector<1x384xi32> to vector<1x1x384xi32>
    %cst_48 = arith.constant dense<0> : vector<1xi32>
    %334 = vector.multi_reduction <add>, %333, %cst_48 [1, 2] : vector<1x1x384xi32> to vector<1xi32>
    %335 = vector.shape_cast %334 : vector<1xi32> to vector<1x1x1xi32>
    %336 = vector.extract %335[0, 0, 0] : i32 from vector<1x1x1xi32>
    %337 = arith.cmpi sge, %336, %45 : i32
    %338 = arith.select %337, %329, %328 : i32
    %c2_i32 = arith.constant 2 : i32
    %339 = arith.ori %338, %c2_i32 : i32
    %340 = vector.broadcast %339 : i32 to vector<1x384xi32>
    %341 = arith.cmpi sge, %48, %340 : vector<1x384xi32>
    %342 = arith.extui %341 : vector<1x384xi1> to vector<1x384xi32>
    %343 = vector.shape_cast %342 : vector<1x384xi32> to vector<1x1x384xi32>
    %cst_49 = arith.constant dense<0> : vector<1xi32>
    %344 = vector.multi_reduction <add>, %343, %cst_49 [1, 2] : vector<1x1x384xi32> to vector<1xi32>
    %345 = vector.shape_cast %344 : vector<1xi32> to vector<1x1x1xi32>
    %346 = vector.extract %345[0, 0, 0] : i32 from vector<1x1x1xi32>
    %347 = arith.cmpi sge, %346, %45 : i32
    %348 = arith.select %347, %339, %338 : i32
    %c1_i32 = arith.constant 1 : i32
    %349 = arith.ori %348, %c1_i32 : i32
    %350 = vector.broadcast %349 : i32 to vector<1x384xi32>
    %351 = arith.cmpi sge, %48, %350 : vector<1x384xi32>
    %352 = arith.extui %351 : vector<1x384xi1> to vector<1x384xi32>
    %353 = vector.shape_cast %352 : vector<1x384xi32> to vector<1x1x384xi32>
    %cst_50 = arith.constant dense<0> : vector<1xi32>
    %354 = vector.multi_reduction <add>, %353, %cst_50 [1, 2] : vector<1x1x384xi32> to vector<1xi32>
    %355 = vector.shape_cast %354 : vector<1xi32> to vector<1x1x1xi32>
    %356 = vector.extract %355[0, 0, 0] : i32 from vector<1x1x1xi32>
    %357 = arith.cmpi sge, %356, %45 : i32
    %358 = arith.select %357, %349, %348 : i32
    %359 = vector.broadcast %358 : i32 to vector<1x384xi32>
    %360 = arith.cmpi sgt, %48, %359 : vector<1x384xi32>
    %361 = arith.extui %360 : vector<1x384xi1> to vector<1x384xi32>
    %362 = vector.shape_cast %361 : vector<1x384xi32> to vector<1x1x384xi32>
    %cst_51 = arith.constant dense<0> : vector<1xi32>
    %363 = vector.multi_reduction <add>, %362, %cst_51 [1, 2] : vector<1x1x384xi32> to vector<1xi32>
    %364 = vector.shape_cast %363 : vector<1xi32> to vector<1x1x1xi32>
    %365 = vector.extract %364[0, 0, 0] : i32 from vector<1x1x1xi32>
    %cst_52 = arith.constant 0.000000e+00 : f32
    %366 = vector.broadcast %cst_52 : f32 to vector<1x384xf32>
    %367 = arith.select %360, %20, %366 : vector<1x384xi1>, vector<1x384xf32>
    %368 = vector.shape_cast %367 : vector<1x384xf32> to vector<1x1x384xf32>
    %cst_53 = arith.constant dense<0.000000e+00> : vector<1xf32>
    %369 = vector.multi_reduction <add>, %368, %cst_53 [1, 2] : vector<1x1x384xf32> to vector<1xf32>
    %370 = vector.shape_cast %369 : vector<1xf32> to vector<1x1x1xf32>
    %371 = vector.extract %370[0, 0, 0] : f32 from vector<1x1x1xf32>
    %372 = vector.broadcast %358 : i32 to vector<1x384xi32>
    %373 = arith.cmpi eq, %48, %372 : vector<1x384xi32>
    %cst_54 = arith.constant 0.000000e+00 : f32
    %374 = vector.broadcast %cst_54 : f32 to vector<1x384xf32>
    %375 = arith.select %373, %20, %374 : vector<1x384xi1>, vector<1x384xf32>
    %376 = vector.shape_cast %375 : vector<1x384xf32> to vector<1x1x384xf32>
    %cst_55 = arith.constant dense<0xFF800000> : vector<1xf32>
    %377 = vector.multi_reduction <maximumf>, %376, %cst_55 [1, 2] : vector<1x1x384xf32> to vector<1xf32>
    %378 = vector.shape_cast %377 : vector<1xf32> to vector<1x1x1xf32>
    %379 = vector.extract %378[0, 0, 0] : f32 from vector<1x1x1xf32>
    %c0_i32_56 = arith.constant 0 : i32
    %380 = arith.cmpi sgt, %45, %c0_i32_56 : i32
    %381 = arith.subi %45, %365 : i32
    %382 = arith.sitofp %381 : i32 to f32
    %383 = arith.mulf %382, %379 : f32
    %cst_57 = arith.constant 0.000000e+00 : f32
    %384 = arith.select %380, %383, %cst_57 : f32
    %385 = arith.addf %371, %384 : f32
    %cst_58 = arith.constant 0.000000e+00 : f32
    %386 = vector.broadcast %cst_58 : f32 to vector<1x384xf32>
    %387 = arith.subf %386, %29 : vector<1x384xf32>
    %cst_59 = arith.constant 0.000000e+00 : f32
    %388 = vector.broadcast %cst_59 : f32 to vector<1x384xf32>
    %389 = arith.select %31, %387, %388 : vector<1x384xi1>, vector<1x384xf32>
    %390 = vector.shape_cast %389 : vector<1x384xf32> to vector<1x1x384xf32>
    %cst_60 = arith.constant dense<0.000000e+00> : vector<1xf32>
    %391 = vector.multi_reduction <add>, %390, %cst_60 [1, 2] : vector<1x1x384xf32> to vector<1xf32>
    %392 = vector.shape_cast %391 : vector<1xf32> to vector<1x1x1xf32>
    %393 = vector.extract %392[0, 0, 0] : f32 from vector<1x1x1xf32>
    %394 = arith.addf %393, %385 : f32
    %395 = arith.subf %3, %5 : vector<4x384xf32>
    %396 = math.absf %395 : vector<4x384xf32>
    %cst_61 = arith.constant 1.000000e+00 : f32
    %397 = vector.broadcast %cst_61 : f32 to vector<4x384xf32>
    %398 = arith.cmpf olt, %396, %397 : vector<4x384xf32>
    %cst_62 = arith.constant 5.000000e-01 : f32
    %399 = vector.broadcast %cst_62 : f32 to vector<4x384xf32>
    %400 = arith.mulf %399, %395 : vector<4x384xf32>
    %401 = arith.mulf %400, %395 : vector<4x384xf32>
    %cst_63 = arith.constant 5.000000e-01 : f32
    %402 = vector.broadcast %cst_63 : f32 to vector<4x384xf32>
    %403 = arith.subf %396, %402 : vector<4x384xf32>
    %404 = arith.select %398, %401, %403 : vector<4x384xi1>, vector<4x384xf32>
    %cst_64 = arith.constant 0.000000e+00 : f32
    %405 = vector.shape_cast %31 : vector<1x384xi1> to vector<1x384xi1>
    %406 = vector.broadcast %405 : vector<1x384xi1> to vector<4x384xi1>
    %407 = vector.broadcast %cst_64 : f32 to vector<4x384xf32>
    %408 = arith.select %406, %404, %407 : vector<4x384xi1>, vector<4x384xf32>
    %409 = vector.shape_cast %408 : vector<4x384xf32> to vector<1x4x384xf32>
    %cst_65 = arith.constant dense<0.000000e+00> : vector<1xf32>
    %410 = vector.multi_reduction <add>, %409, %cst_65 [1, 2] : vector<1x4x384xf32> to vector<1xf32>
    %411 = vector.shape_cast %410 : vector<1xf32> to vector<1x1x1xf32>
    %412 = vector.extract %411[0, 0, 0] : f32 from vector<1x1x1xf32>
    %413 = tpu.iota {dimensions = array<i32: 2>} : vector<1x8x128xi32>
    %c0_i32_66 = arith.constant 0 : i32
    %414 = vector.broadcast %c0_i32_66 : i32 to vector<1x8x128xi32>
    %415 = arith.cmpi eq, %413, %414 : vector<1x8x128xi32>
    %c1_i32_67 = arith.constant 1 : i32
    %416 = vector.broadcast %c1_i32_67 : i32 to vector<1x8x128xi32>
    %417 = arith.cmpi eq, %413, %416 : vector<1x8x128xi32>
    %c2_i32_68 = arith.constant 2 : i32
    %418 = vector.broadcast %c2_i32_68 : i32 to vector<1x8x128xi32>
    %419 = arith.cmpi eq, %413, %418 : vector<1x8x128xi32>
    %420 = arith.sitofp %38 : i32 to f32
    %cst_69 = arith.constant 0.000000e+00 : f32
    %421 = vector.broadcast %420 : f32 to vector<1x8x128xf32>
    %422 = vector.broadcast %cst_69 : f32 to vector<1x8x128xf32>
    %423 = arith.select %419, %421, %422 : vector<1x8x128xi1>, vector<1x8x128xf32>
    %424 = vector.broadcast %412 : f32 to vector<1x8x128xf32>
    %425 = arith.select %417, %424, %423 : vector<1x8x128xi1>, vector<1x8x128xf32>
    %426 = vector.broadcast %394 : f32 to vector<1x8x128xf32>
    %427 = arith.select %415, %426, %425 : vector<1x8x128xi1>, vector<1x8x128xf32>
    %c0_70 = arith.constant 0 : index
    %c0_71 = arith.constant 0 : index
    %c0_72 = arith.constant 0 : index
    %428 = vector.load %arg5[%c0_70, %c0_71, %c0_72] : memref<1x8x128xf32, #tpu.memory_space<vmem>>, vector<1x8x128xf32>
    tpu.vector_store %arg5[%c0_70, %c0_71, %c0_72], %427 {strides = array<i32>} : memref<1x8x128xf32, #tpu.memory_space<vmem>>, vector<1x8x128xf32>,
    return
  }
  func.func @transform_0(%arg0: i32) -> (i32, i32, i32) {
    %c0_i32 = arith.constant 0 : i32
    %c0_i32_0 = arith.constant 0 : i32
    %c0_i32_1 = arith.constant 0 : i32
    return %arg0, %c0_i32, %c0_i32_0 : i32, i32, i32
  }
  func.func @transform_1(%arg0: i32) -> (i32, i32, i32) {
    %c0_i32 = arith.constant 0 : i32
    %c0_i32_0 = arith.constant 0 : i32
    %c0_i32_1 = arith.constant 0 : i32
    return %arg0, %c0_i32, %c0_i32_0 : i32, i32, i32
  }
  func.func @transform_2(%arg0: i32) -> (i32, i32, i32) {
    %c0_i32 = arith.constant 0 : i32
    %c0_i32_0 = arith.constant 0 : i32
    %c0_i32_1 = arith.constant 0 : i32
    return %arg0, %c0_i32, %c0_i32_0 : i32, i32, i32
  }
  func.func @transform_3(%arg0: i32) -> (i32, i32, i32) {
    %c0_i32 = arith.constant 0 : i32
    %c0_i32_0 = arith.constant 0 : i32
    %c0_i32_1 = arith.constant 0 : i32
    return %arg0, %c0_i32, %c0_i32_0 : i32, i32, i32
  }
  func.func @transform_4(%arg0: i32) -> (i32, i32, i32) {
    %c0_i32 = arith.constant 0 : i32
    %c0_i32_0 = arith.constant 0 : i32
    %c0_i32_1 = arith.constant 0 : i32
    return %arg0, %c0_i32, %c0_i32_0 : i32, i32, i32
  }
}

</mosaic_0001>

<bundles_post_ra>
// kernel: multibox_loss.1
= control target key start
LH: loop header
LB: loop body
LE: loop exit
PB: predicated region body
PF: predicated region fallthrough
CT: control target
= control target key end

     0   :  { %s1863_s15 = smov 0   ;;  %s2482_s0 = inlined_call_operand.vmem [shape: f32[2,8,384], index: 0, kind: input, shape index: {}]   ;;  %s2483_s1 = inlined_call_operand.vmem [shape: f32[2,4,384], index: 1, kind: input, shape index: {}]   ;;  %s2484_s2 = inlined_call_operand.vmem [shape: f32[2,4,384], index: 2, kind: input, shape index: {}]   ;;  %s2485_s3 = inlined_call_operand.vmem [shape: s32[2,1,384], index: 3, kind: input, shape index: {}]   ;;  %s2486_s4 = inlined_call_operand.vmem [shape: f32[2,8,128], index: 4, kind: output, shape index: {}]  }
   0x1 LB: > { %s1712_s16 = sadd.s32 4294967295, %s1835_s15   ;;  %p1716_p0 = scmp.ge.s32.totalorder %s1835_s15, 1  ;;  %s1835_s15 = sphi %s1863_s15, %s14_s15  }
   0x2   : > { %p191_p1 = scmp.lt.s32.totalorder %s1835_s15, 3 }
   0x4   : > { %p192_p2 = pnand %p1716_p0, %p191_p1 }
   0x5   : > { %p230_p3 = scmp.lt.s32.totalorder (!%p192_p2), %s1712_s16, 1 }
   0x6   : > { %195 = sbr.rel (%p192_p2) target bundleno = 6552 (0x1998), region = 36 }
   0xb   : > { %s2496_s16 = smov (!%p230_p3, %s1712_s16), 1  ;;  %v1837_v4 = vmov 0   ;;  %vm362_vm1 = vcmask 1040384   ;;  %vm424_vm3 = vcmask 1041408  }
   0xc   : > { %s1727_s17 = smul.u32 3, %s2496_s16 }
   0xd   : > { %s1725_s18 = smul.u32 24, %s2496_s16 }
   0xe   : > { %s1878_s21 = scalar_lea.vmem %s2485_s3, %s1727_s17 }
   0xf   : > { %v1881_v0 = vld [vmem:[%s1878_s21] sm:$0x7]  ;;  %s1886_s24 = scalar_lea.vmem %s2482_s0, %s1725_s18 }
  0x10   : > { %vm356_vm0 = vcmp.gt.s32.totalorder %v1881_v0, 0  ;;  %v1890_v1 = vld [vmem:[%s1886_s24] sm:$0xff]  ;;  %v1893_v2 = vld [vmem:[%s1886_s24 + $0x8] sm:$0xff]  ;;  %v1896_v3 = vld [vmem:[%s1886_s24 + $0x10] sm:$0xff]  ;;  %vm357_vm2 = vcmp.eq.s32.totalorder %v1881_v0, 0 }
  0x11   : > { %v1901_v5 = vsel %vm356_vm0, 1, %v1837_v4  ;;  %v261_v6 = vrot.slane %v1890_v1, 4  ;;  %v267_v10 = vrot.slane %v1893_v2, 4  ;;  %v273_v12 = vrot.slane %v1896_v3, 4 }
  0x12   : > { %v359_v7 = vperm.slane %v1901_v5, 0  ;;  %v360_v8 = vperm.slane %v1901_v5, 1  ;;  %v361_v9 = vperm.slane %v1901_v5, 2  ;;  %v387_v25 = vsel %vm357_vm2, 1, %v1837_v4 }
  0x13   : > { %v262_v11 = vmax.f32 %v1890_v1, %v261_v6  ;;  %v268_v16 = vmax.f32 %v1893_v2, %v267_v10  ;;  %v274_v19 = vmax.f32 %v1896_v3, %v273_v12  ;;  %v388_v29 = vperm.slane %v387_v25, 0 }
  0x14   : > { %v363_v13 = vsel %vm362_vm1, %v359_v7, 0  ;;  %v364_v14 = vsel %vm362_vm1, %v360_v8, 0  ;;  %v365_v15 = vsel %vm362_vm1, %v361_v9, 0  ;;  %v389_v31 = vperm.slane %v387_v25, 1 }
  0x15   : > { %v366_v17 = vadd.s32 %v364_v14, %v363_v13  ;;  %v263_v18 = vrot.slane %v262_v11, 2  ;;  %v269_v20 = vrot.slane %v268_v16, 2  ;;  %v275_v23 = vrot.slane %v274_v19, 2 }
  0x16   : > { %v390_v35 = vperm.slane %v387_v25, 2  ;;  %v391_v37 = vsel %vm362_vm1, %v388_v29, 0  ;;  %v392_v38 = vsel %vm362_vm1, %v389_v31, 0 }
  0x17   : > { %v367_v21 = vadd.s32 %v366_v17, %v365_v15  ;;  %v264_v22 = vmax.f32 %v262_v11, %v263_v18  ;;  %v270_v24 = vmax.f32 %v268_v16, %v269_v20  ;;  %v276_v28 = vmax.f32 %v274_v19, %v275_v23 }
  0x18   : > { %v393_v41 = vsel %vm362_vm1, %v390_v35, 0  ;;  %v394_v42 = vadd.s32 %v392_v38, %v391_v37 }
  0x19   : > { %v369_v26 = vshrl.u32 %v367_v21, 16  ;;  %v265_v27 = vrot.slane %v264_v22, 1  ;;  %v271_v30 = vrot.slane %v270_v24, 1  ;;  %v277_v34 = vrot.slane %v276_v28, 1 }
  0x1a   : > { %v395_v46 = vadd.s32 %v394_v42, %v393_v41  ;;  %v368_v51 = vand.u32 65535, %v367_v21 }
  0x1b   : > { %v371_v32 = vcvt.s32.f32 %v369_v26  ;;  %v1925_v33 = vmax.f32 %v264_v22, %v265_v27  ;;  %v1927_v36 = vmax.f32 %v270_v24, %v271_v30  ;;  %v1931_v39 = vmax.f32 %v276_v28, %v277_v34 }
  0x1c   : > { %v397_v49 = vshrl.u32 %v395_v46, 16  ;;  %v370_v55 = vcvt.s32.f32 %v368_v51  ;;  %v396_v56 = vand.u32 65535, %v395_v46 }
  0x1d   : > { %374 = vadd.xlane.f32.xlu0 %v371_v32  ;;  %v279_v40 = vsub.f32 %v1890_v1, %v1925_v33  ;;  %v280_v43 = vsub.f32 %v1893_v2, %v1927_v36  ;;  %v281_v44 = vsub.f32 %v1896_v3, %v1931_v39 }
  0x1e   : > { %v399_v50 = vcvt.s32.f32 %v397_v49  ;;  %v398_v61 = vcvt.s32.f32 %v396_v56 }
  0x1f   : > { %v282_v45 = vmul.f32 1.442695, %v279_v40  ;;  %v284_v47 = vmul.f32 1.442695, %v280_v43  ;;  %v286_v48 = vmul.f32 1.442695, %v281_v44 }
  0x20   : > { %402 = vadd.xlane.f32.xlu1 %v399_v50 }
  0x21   : > { %1813 = vpow2.f32 %v282_v45 }
  0x22   : > { %1815 = vpow2.f32 %v284_v47 }
  0x23   : > { %1817 = vpow2.f32 %v286_v48 }
  0x25   : > { %372 = vadd.xlane.f32.xlu0 %v370_v55 }
  0x27   : > { %v1814_v52 = vpop.eup %1813 }
  0x28   : > { %v1816_v53 = vpop.eup %1815  ;;  %v288_v54 = vrot.slane %v1814_v52, 4  ;;  %400 = vadd.xlane.f32.xlu1 %v398_v61 }
  0x29   : > { %v1818_v57 = vpop.eup %1817  ;;  %v294_v58 = vrot.slane %v1816_v53, 4 }
  0x2a   : > { %v289_v59 = vadd.f32 %v1814_v52, %v288_v54  ;;  %v300_v60 = vrot.slane %v1818_v57, 4 }
  0x2b   : > { %v295_v62 = vadd.f32 %v1816_v53, %v294_v58 }
  0x2c   : > { %v290_v63 = vrot.slane %v289_v59, 2  ;;  %v301_v6 = vadd.f32 %v1818_v57, %v300_v60 }
  0x2d   : > { %v296_v10 = vrot.slane %v295_v62, 2 }
  0x2e   : > { %v291_v11 = vadd.f32 %v290_v63, %v289_v59  ;;  %v302_v12 = vrot.slane %v301_v6, 2 }
  0x2f   : > { %v297_v13 = vadd.f32 %v296_v10, %v295_v62 }
  0x30   : > { %v292_v14 = vrot.slane %v291_v11, 1  ;;  %v303_v15 = vadd.f32 %v302_v12, %v301_v6 }
  0x31   : > { %v298_v16 = vrot.slane %v297_v13, 1 }
  0x32   : > { %v293_v17 = vadd.f32 %v292_v14, %v291_v11  ;;  %v304_v18 = vrot.slane %v303_v15, 1 }
  0x33   : > { %v299_v19 = vadd.f32 %v298_v16, %v297_v13 }
  0x34   : > { %v305_v20 = vadd.f32 %v304_v18, %v303_v15  ;;  %1819 = vlog2.f32 %v293_v17 }
  0x35   : > { %1821 = vlog2.f32 %v299_v19 }
  0x36   : > { %1823 = vlog2.f32 %v305_v20 }
  0x3a   : > { %v1820_v21 = vpop.eup %1819 }
  0x3b   : > { %v1822_v22 = vpop.eup %1821  ;;  %v1940_v23 = vmul.f32 0.6931472, %v1820_v21 }
  0x3c   : > { %v1824_v24 = vpop.eup %1823  ;;  %v1942_v25 = vmul.f32 0.6931472, %v1822_v22 }
  0x3d   : > { %v1944_v26 = vmul.f32 0.6931472, %v1824_v24  ;;  %v312_v27 = vadd.f32 %v1940_v23, %v1925_v33 }
  0x3e   : > { %v313_v28 = vadd.f32 %v1942_v25, %v1927_v36 }
  0x3f   : > { %v314_v29 = vadd.f32 %v1944_v26, %v1931_v39  ;;  %v315_v30 = vsub.f32 %v312_v27, %v1890_v1 }
  0x40   : > { %v316_v31 = vsub.f32 %v313_v28, %v1893_v2 }
  0x41   : > { %v317_v32 = vsub.f32 %v314_v29, %v1896_v3  ;;  %v318_v34 = vmax.f32 %v315_v30, 0.0 }
  0x42   : > { %v319_v35 = vmax.f32 %v316_v31, 0.0 }
  0x43   : > { %v320_v37 = vmax.f32 %v317_v32, 0.0 }
  0x44   : > { %v421_v38 = vrot.slane %v319_v35, 7  ;;  %v321_v35 = vlaneseq }
  0x45   : > { %v422_v40 = vrot.slane %v320_v37, 6 }
  0x46   : > { %v423_v41 = vsel %vm362_vm1, %v318_v34, %v421_v38 }
  0x47   : > { %v1957_v42 = vsel %vm424_vm3, %v423_v41, %v422_v40  ;;  %v1970_v40 = vand.u32 127, %v321_v35 }
  0x48   : > { %v1962_v43 = vsel %vm357_vm2, %v1957_v42, 4294967295 }
  0x49   : > { %vm427_vm4 = vcmp.ge.s32.totalorder %v1962_v43, 1073741824  ;;  %vm1614_vm5 = vcmp.eq.s32.totalorder %v1970_v40, 2 }
  0x4a   : > { %v428_v1 = vsel %vm427_vm4, 1, %v1837_v4 }
  0x4b   : > { %v429_v2 = vperm.slane %v428_v1, 0  ;;  %v430_v3 = vperm.slane %v428_v1, 1  ;;  %v431_v44 = vperm.slane %v428_v1, 2 }
  0x4d   : > { %v432_v45 = vsel %vm362_vm1, %v429_v2, 0  ;;  %v433_v46 = vsel %vm362_vm1, %v430_v3, 0  ;;  %v434_v47 = vsel %vm362_vm1, %v431_v44, 0 }
  0x4e   : > { %v435_v48 = vadd.s32 %v433_v46, %v432_v45 }
  0x50   : > { %v436_v49 = vadd.s32 %v435_v48, %v434_v47 }
  0x52   : > { %v438_v50 = vshrl.u32 %v436_v49, 16  ;;  %v437_v52 = vand.u32 65535, %v436_v49 }
  0x54   : > { %v440_v51 = vcvt.s32.f32 %v438_v50  ;;  %v439_v53 = vcvt.s32.f32 %v437_v52 }
  0x56   : > { %443 = vadd.xlane.f32.xlu2 %v440_v51 }
  0x5e   : > { %441 = vadd.xlane.f32.xlu2 %v439_v53 }
  0x90   : > { %v375_v54 = vpop.xlane.xlu0 %374 }
  0x91   : > { %v377_v55 = vcvt.f32.s32 %v375_v54 }
  0x93   : > { %v403_v56 = vpop.xlane.xlu1 %402  ;;  %v378_v58 = vshll.u32 %v377_v55, 16 }
  0x94   : > { %v405_v57 = vcvt.f32.s32 %v403_v56 }
  0x96   : > { %v406_v61 = vshll.u32 %v405_v57, 16 }
  0x98   : > { %v373_v59 = vpop.xlane.xlu0 %372 }
  0x99   : > { %v376_v60 = vcvt.f32.s32 %v373_v59 }
  0x9b   : > { %v379_v62 = vadd.s32 %v378_v58, %v376_v60  ;;  %v401_v63 = vpop.xlane.xlu1 %400 }
  0x9c   : > { %v404_v6 = vcvt.f32.s32 %v401_v63 }
  0x9d   : > { %v380_v10 = vrot.slane %v379_v62, 4 }
  0x9e   : > { %v407_v11 = vadd.s32 %v406_v61, %v404_v6 }
  0x9f   : > { %v381_v12 = vadd.s32 %v380_v10, %v379_v62 }
  0xa0   : > { %v408_v13 = vrot.slane %v407_v11, 4 }
  0xa1   : > { %v382_v14 = vrot.slane %v381_v12, 2 }
  0xa2   : > { %v409_v15 = vadd.s32 %v408_v13, %v407_v11 }
  0xa3   : > { %v383_v16 = vadd.s32 %v382_v14, %v381_v12 }
  0xa4   : > { %v410_v17 = vrot.slane %v409_v15, 2 }
  0xa5   : > { %v384_v18 = vrot.slane %v383_v16, 1 }
  0xa6   : > { %v411_v19 = vadd.s32 %v410_v17, %v409_v15 }
  0xa7   : > { %v385_v20 = vadd.s32 %v384_v18, %v383_v16 }
  0xa8   : > { %v412_v21 = vrot.slane %v411_v19, 1 }
  0xa9   : > { %1728 = vpush %v385_v20 }
  0xaa   : > { %v413_v22 = vadd.s32 %v412_v21, %v411_v19 }
  0xac   : > { %1730 = vpush %v413_v22 }
  0xc9   : > { %v444_v24 = vpop.xlane.xlu2 %443 }
  0xca   : > { %v446_v27 = vcvt.f32.s32 %v444_v24 }
  0xcc   : > { %v447_v29 = vshll.u32 %v446_v27, 16 }
  0xd1   : > { %v442_v28 = vpop.xlane.xlu2 %441 }
  0xd2   : > { %v445_v30 = vcvt.f32.s32 %v442_v28 }
  0xd4   : > { %v448_v31 = vadd.s32 %v447_v29, %v445_v30 }
  0xd6   : > { %v449_v32 = vrot.slane %v448_v31, 4 }
  0xd8   : > { %v450_v34 = vadd.s32 %v449_v32, %v448_v31 }
  0xda   : > { %v451_v37 = vrot.slane %v450_v34, 2  ;;  %s1729_s25 = spop %1728 }
  0xdb   : > { %s1615_s26 = scvt.s32.f32 %s1729_s25  ;;  %s415_s27 = smul.u32 3, %s1729_s25 }
  0xdc   : > { %v452_v38 = vadd.s32 %v451_v37, %v450_v34 }
  0xdd   : > { %v1616_v2 = vstv %s1615_s26  ;;  %s1731_s28 = spop %1730 }
  0xde   : > { %v453_v41 = vrot.slane %v452_v38, 1  ;;  %v1973_v3 = vsel %vm1614_vm5, %v1616_v2, 0.0  ;;  %p416_p4 = scmp.lt.s32.totalorder %s415_s27, %s1731_s28 }
  0xe0   : > { %v454_v1 = vadd.s32 %v453_v41, %v452_v38  ;;  %s2498_s27 = smov (!%p416_p4, %s415_s27), %s1731_s28 }
  0xe2   : > { %1732 = vpush %v454_v1 }
 0x113   : > { %s1733_s29 = spop %1732 }
 0x114   : > { %p456_p5 = scmp.ge.s32.totalorder %s1733_s29, %s2498_s27 }
 0x116   : > { %s1978_s30 = scalar_select %p456_p5, 1073741824, 0 }
 0x118   : > { %s458_s5 = sor.u32 536870912, %s1978_s30 }
 0x119   : > { %v459_v44 = vstv %s458_s5 }
 0x11a   : > { %vm460_vm6 = vcmp.ge.s32.totalorder %v1962_v43, %v459_v44 }
 0x11b   : > { %v461_v45 = vsel %vm460_vm6, 1, %v1837_v4 }
 0x11c   : > { %v462_v46 = vperm.slane %v461_v45, 0  ;;  %v463_v47 = vperm.slane %v461_v45, 1  ;;  %v464_v48 = vperm.slane %v461_v45, 2 }
 0x11e   : > { %v465_v49 = vsel %vm362_vm1, %v462_v46, 0  ;;  %v466_v50 = vsel %vm362_vm1, %v463_v47, 0  ;;  %v467_v52 = vsel %vm362_vm1, %v464_v48, 0 }
 0x11f   : > { %v468_v51 = vadd.s32 %v466_v50, %v465_v49 }
 0x121   : > { %v469_v53 = vadd.s32 %v468_v51, %v467_v52 }
 0x123   : > { %v471_v54 = vshrl.u32 %v469_v53, 16  ;;  %v470_v55 = vand.u32 65535, %v469_v53 }
 0x125   : > { %v473_v56 = vcvt.s32.f32 %v471_v54  ;;  %v472_v57 = vcvt.s32.f32 %v470_v55 }
 0x127   : > { %476 = vadd.xlane.f32.xlu0 %v473_v56  ;;  %474 = vadd.xlane.f32.xlu1 %v472_v57 }
 0x19a   : > { %v477_v58 = vpop.xlane.xlu0 %476  ;;  %v475_v59 = vpop.xlane.xlu1 %474 }
 0x19b   : > { %v479_v60 = vcvt.f32.s32 %v477_v58  ;;  %v478_v62 = vcvt.f32.s32 %v475_v59 }
 0x19d   : > { %v480_v61 = vshll.u32 %v479_v60, 16 }
 0x19f   : > { %v481_v63 = vadd.s32 %v480_v61, %v478_v62 }
 0x1a1   : > { %v482_v6 = vrot.slane %v481_v63, 4 }
 0x1a3   : > { %v483_v10 = vadd.s32 %v482_v6, %v481_v63 }
 0x1a5   : > { %v484_v11 = vrot.slane %v483_v10, 2 }
 0x1a7   : > { %v485_v12 = vadd.s32 %v484_v11, %v483_v10 }
 0x1a9   : > { %v486_v13 = vrot.slane %v485_v12, 1 }
 0x1ab   : > { %v487_v14 = vadd.s32 %v486_v13, %v485_v12 }
 0x1ad   : > { %1734 = vpush %v487_v14 }
 0x1de   : > { %s1735_s6 = spop %1734 }
 0x1df   : > { %p489_p6 = scmp.ge.s32.totalorder %s1735_s6, %s2498_s27 }
 0x1e1   : > { %s2500_s5 = smov (!%p489_p6, %s458_s5), %s1978_s30 }
 0x1e2   : > { %s491_s7 = sor.u32 268435456, %s2500_s5 }
 0x1e3   : > { %v492_v15 = vstv %s491_s7 }
 0x1e4   : > { %vm493_vm7 = vcmp.ge.s32.totalorder %v1962_v43, %v492_v15 }
 0x1e5   : > { %v494_v16 = vsel %vm493_vm7, 1, %v1837_v4 }
 0x1e6   : > { %v495_v17 = vperm.slane %v494_v16, 0  ;;  %v496_v18 = vperm.slane %v494_v16, 1  ;;  %v497_v19 = vperm.slane %v494_v16, 2 }
 0x1e8   : > { %v498_v20 = vsel %vm362_vm1, %v495_v17, 0  ;;  %v499_v21 = vsel %vm362_vm1, %v496_v18, 0  ;;  %v500_v24 = vsel %vm362_vm1, %v497_v19, 0 }
 0x1e9   : > { %v501_v22 = vadd.s32 %v499_v21, %v498_v20 }
 0x1eb   : > { %v502_v27 = vadd.s32 %v501_v22, %v500_v24 }
 0x1ed   : > { %v504_v28 = vshrl.u32 %v502_v27, 16  ;;  %v503_v29 = vand.u32 65535, %v502_v27 }
 0x1ef   : > { %v506_v30 = vcvt.s32.f32 %v504_v28  ;;  %v505_v31 = vcvt.s32.f32 %v503_v29 }
 0x1f1   : > { %509 = vadd.xlane.f32.xlu2 %v506_v30  ;;  %507 = vadd.xlane.f32.xlu0 %v505_v31 }
 0x264   : > { %v510_v32 = vpop.xlane.xlu2 %509  ;;  %v508_v34 = vpop.xlane.xlu0 %507 }
 0x265   : > { %v512_v37 = vcvt.f32.s32 %v510_v32  ;;  %v511_v41 = vcvt.f32.s32 %v508_v34 }
 0x267   : > { %v513_v38 = vshll.u32 %v512_v37, 16 }
 0x269   : > { %v514_v1 = vadd.s32 %v513_v38, %v511_v41 }
 0x26b   : > { %v515_v2 = vrot.slane %v514_v1, 4 }
 0x26d   : > { %v516_v44 = vadd.s32 %v515_v2, %v514_v1 }
 0x26f   : > { %v517_v45 = vrot.slane %v516_v44, 2 }
 0x271   : > { %v518_v46 = vadd.s32 %v517_v45, %v516_v44 }
 0x273   : > { %v519_v47 = vrot.slane %v518_v46, 1 }
 0x275   : > { %v520_v48 = vadd.s32 %v519_v47, %v518_v46 }
 0x277   : > { %1736 = vpush %v520_v48 }
 0x2a8   : > { %s1737_s8 = spop %1736 }
 0x2a9   : > { %p522_p7 = scmp.ge.s32.totalorder %s1737_s8, %s2498_s27 }
 0x2ab   : > { %s2502_s7 = smov (!%p522_p7, %s491_s7), %s2500_s5 }
 0x2ac   : > { %s524_s9 = sor.u32 134217728, %s2502_s7 }
 0x2ad   : > { %v525_v49 = vstv %s524_s9 }
 0x2ae   : > { %vm526_vm8 = vcmp.ge.s32.totalorder %v1962_v43, %v525_v49 }
 0x2af   : > { %v527_v50 = vsel %vm526_vm8, 1, %v1837_v4 }
 0x2b0   : > { %v528_v51 = vperm.slane %v527_v50, 0  ;;  %v529_v52 = vperm.slane %v527_v50, 1  ;;  %v530_v53 = vperm.slane %v527_v50, 2 }
 0x2b2   : > { %v531_v54 = vsel %vm362_vm1, %v528_v51, 0  ;;  %v532_v55 = vsel %vm362_vm1, %v529_v52, 0  ;;  %v533_v57 = vsel %vm362_vm1, %v530_v53, 0 }
 0x2b3   : > { %v534_v56 = vadd.s32 %v532_v55, %v531_v54 }
 0x2b5   : > { %v535_v58 = vadd.s32 %v534_v56, %v533_v57 }
 0x2b7   : > { %v537_v59 = vshrl.u32 %v535_v58, 16  ;;  %v536_v60 = vand.u32 65535, %v535_v58 }
 0x2b9   : > { %v539_v61 = vcvt.s32.f32 %v537_v59  ;;  %v538_v62 = vcvt.s32.f32 %v536_v60 }
 0x2bb   : > { %542 = vadd.xlane.f32.xlu1 %v539_v61  ;;  %540 = vadd.xlane.f32.xlu2 %v538_v62 }
 0x32e   : > { %v543_v63 = vpop.xlane.xlu1 %542  ;;  %v541_v6 = vpop.xlane.xlu2 %540 }
 0x32f   : > { %v545_v10 = vcvt.f32.s32 %v543_v63  ;;  %v544_v12 = vcvt.f32.s32 %v541_v6 }
 0x331   : > { %v546_v11 = vshll.u32 %v545_v10, 16 }
 0x333   : > { %v547_v13 = vadd.s32 %v546_v11, %v544_v12 }
 0x335   : > { %v548_v14 = vrot.slane %v547_v13, 4 }
 0x337   : > { %v549_v15 = vadd.s32 %v548_v14, %v547_v13 }
 0x339   : > { %v550_v16 = vrot.slane %v549_v15, 2 }
 0x33b   : > { %v551_v17 = vadd.s32 %v550_v16, %v549_v15 }
 0x33d   : > { %v552_v18 = vrot.slane %v551_v17, 1 }
 0x33f   : > { %v553_v19 = vadd.s32 %v552_v18, %v551_v17 }
 0x341   : > { %1738 = vpush %v553_v19 }
 0x372   : > { %s1739_s10 = spop %1738 }
 0x373   : > { %p555_p8 = scmp.ge.s32.totalorder %s1739_s10, %s2498_s27 }
 0x375   : > { %s2504_s9 = smov (!%p555_p8, %s524_s9), %s2502_s7 }
 0x376   : > { %s557_s11 = sor.u32 67108864, %s2504_s9 }
 0x377   : > { %v558_v20 = vstv %s557_s11 }
 0x378   : > { %vm559_vm9 = vcmp.ge.s32.totalorder %v1962_v43, %v558_v20 }
 0x379   : > { %v560_v21 = vsel %vm559_vm9, 1, %v1837_v4 }
 0x37a   : > { %v561_v22 = vperm.slane %v560_v21, 0  ;;  %v562_v24 = vperm.slane %v560_v21, 1  ;;  %v563_v27 = vperm.slane %v560_v21, 2 }
 0x37c   : > { %v564_v28 = vsel %vm362_vm1, %v561_v22, 0  ;;  %v565_v29 = vsel %vm362_vm1, %v562_v24, 0  ;;  %v566_v31 = vsel %vm362_vm1, %v563_v27, 0 }
 0x37d   : > { %v567_v30 = vadd.s32 %v565_v29, %v564_v28 }
 0x37f   : > { %v568_v32 = vadd.s32 %v567_v30, %v566_v31 }
 0x381   : > { %v570_v34 = vshrl.u32 %v568_v32, 16  ;;  %v569_v37 = vand.u32 65535, %v568_v32 }
 0x383   : > { %v572_v38 = vcvt.s32.f32 %v570_v34  ;;  %v571_v41 = vcvt.s32.f32 %v569_v37 }
 0x385   : > { %575 = vadd.xlane.f32.xlu0 %v572_v38  ;;  %573 = vadd.xlane.f32.xlu1 %v571_v41 }
 0x3f8   : > { %v576_v1 = vpop.xlane.xlu0 %575  ;;  %v574_v2 = vpop.xlane.xlu1 %573 }
 0x3f9   : > { %v578_v44 = vcvt.f32.s32 %v576_v1  ;;  %v577_v46 = vcvt.f32.s32 %v574_v2 }
 0x3fb   : > { %v579_v45 = vshll.u32 %v578_v44, 16 }
 0x3fd   : > { %v580_v47 = vadd.s32 %v579_v45, %v577_v46 }
 0x3ff   : > { %v581_v48 = vrot.slane %v580_v47, 4 }
 0x401   : > { %v582_v49 = vadd.s32 %v581_v48, %v580_v47 }
 0x403   : > { %v583_v50 = vrot.slane %v582_v49, 2 }
 0x405   : > { %v584_v51 = vadd.s32 %v583_v50, %v582_v49 }
 0x407   : > { %v585_v52 = vrot.slane %v584_v51, 1 }
 0x409   : > { %v586_v53 = vadd.s32 %v585_v52, %v584_v51 }
 0x40b   : > { %1740 = vpush %v586_v53 }
 0x43c   : > { %s1741_s12 = spop %1740 }
 0x43d   : > { %p588_p9 = scmp.ge.s32.totalorder %s1741_s12, %s2498_s27 }
 0x43f   : > { %s2506_s11 = smov (!%p588_p9, %s557_s11), %s2504_s9 }
 0x440   : > { %s590_s13 = sor.u32 33554432, %s2506_s11 }
 0x441   : > { %v591_v54 = vstv %s590_s13 }
 0x442   : > { %vm592_vm10 = vcmp.ge.s32.totalorder %v1962_v43, %v591_v54 }
 0x443   : > { %v593_v55 = vsel %vm592_vm10, 1, %v1837_v4 }
 0x444   : > { %v594_v56 = vperm.slane %v593_v55, 0  ;;  %v595_v57 = vperm.slane %v593_v55, 1  ;;  %v596_v58 = vperm.slane %v593_v55, 2 }
 0x446   : > { %v597_v59 = vsel %vm362_vm1, %v594_v56, 0  ;;  %v598_v60 = vsel %vm362_vm1, %v595_v57, 0  ;;  %v599_v62 = vsel %vm362_vm1, %v596_v58, 0 }
 0x447   : > { %v600_v61 = vadd.s32 %v598_v60, %v597_v59 }
 0x449   : > { %v601_v63 = vadd.s32 %v600_v61, %v599_v62 }
 0x44b   : > { %v603_v6 = vshrl.u32 %v601_v63, 16  ;;  %v602_v10 = vand.u32 65535, %v601_v63 }
 0x44d   : > { %v605_v11 = vcvt.s32.f32 %v603_v6  ;;  %v604_v12 = vcvt.s32.f32 %v602_v10 }
 0x44f   : > { %608 = vadd.xlane.f32.xlu2 %v605_v11  ;;  %606 = vadd.xlane.f32.xlu0 %v604_v12 }
 0x4c2   : > { %v609_v13 = vpop.xlane.xlu2 %608  ;;  %v607_v14 = vpop.xlane.xlu0 %606 }
 0x4c3   : > { %v611_v15 = vcvt.f32.s32 %v609_v13  ;;  %v610_v17 = vcvt.f32.s32 %v607_v14 }
 0x4c5   : > { %v612_v16 = vshll.u32 %v611_v15, 16 }
 0x4c7   : > { %v613_v18 = vadd.s32 %v612_v16, %v610_v17 }
 0x4c9   : > { %v614_v19 = vrot.slane %v613_v18, 4 }
 0x4cb   : > { %v615_v20 = vadd.s32 %v614_v19, %v613_v18 }
 0x4cd   : > { %v616_v21 = vrot.slane %v615_v20, 2 }
 0x4cf   : > { %v617_v22 = vadd.s32 %v616_v21, %v615_v20 }
 0x4d1   : > { %v618_v24 = vrot.slane %v617_v22, 1 }
 0x4d3   : > { %v619_v27 = vadd.s32 %v618_v24, %v617_v22 }
 0x4d5   : > { %1742 = vpush %v619_v27 }
 0x506   : > { %s1743_s14 = spop %1742 }
 0x507   : > { %p621_p10 = scmp.ge.s32.totalorder %s1743_s14, %s2498_s27 }
 0x509   : > { %s2508_s13 = smov (!%p621_p10, %s590_s13), %s2506_s11 }
 0x50a   : > { %s623_s17 = sor.u32 16777216, %s2508_s13 }
 0x50b   : > { %v624_v28 = vstv %s623_s17 }
 0x50c   : > { %vm625_vm11 = vcmp.ge.s32.totalorder %v1962_v43, %v624_v28 }
 0x50d   : > { %v626_v29 = vsel %vm625_vm11, 1, %v1837_v4 }
 0x50e   : > { %v627_v30 = vperm.slane %v626_v29, 0  ;;  %v628_v31 = vperm.slane %v626_v29, 1  ;;  %v629_v32 = vperm.slane %v626_v29, 2 }
 0x510   : > { %v630_v34 = vsel %vm362_vm1, %v627_v30, 0  ;;  %v631_v37 = vsel %vm362_vm1, %v628_v31, 0  ;;  %v632_v41 = vsel %vm362_vm1, %v629_v32, 0 }
 0x511   : > { %v633_v38 = vadd.s32 %v631_v37, %v630_v34 }
 0x513   : > { %v634_v1 = vadd.s32 %v633_v38, %v632_v41 }
 0x515   : > { %v636_v2 = vshrl.u32 %v634_v1, 16  ;;  %v635_v44 = vand.u32 65535, %v634_v1 }
 0x517   : > { %v638_v45 = vcvt.s32.f32 %v636_v2  ;;  %v637_v46 = vcvt.s32.f32 %v635_v44 }
 0x519   : > { %641 = vadd.xlane.f32.xlu1 %v638_v45  ;;  %639 = vadd.xlane.f32.xlu2 %v637_v46 }
 0x58c   : > { %v642_v47 = vpop.xlane.xlu1 %641  ;;  %v640_v48 = vpop.xlane.xlu2 %639 }
 0x58d   : > { %v644_v49 = vcvt.f32.s32 %v642_v47  ;;  %v643_v51 = vcvt.f32.s32 %v640_v48 }
 0x58f   : > { %v645_v50 = vshll.u32 %v644_v49, 16 }
 0x591   : > { %v646_v52 = vadd.s32 %v645_v50, %v643_v51 }
 0x593   : > { %v647_v53 = vrot.slane %v646_v52, 4 }
 0x595   : > { %v648_v54 = vadd.s32 %v647_v53, %v646_v52 }
 0x597   : > { %v649_v55 = vrot.slane %v648_v54, 2 }
 0x599   : > { %v650_v56 = vadd.s32 %v649_v55, %v648_v54 }
 0x59b   : > { %v651_v57 = vrot.slane %v650_v56, 1 }
 0x59d   : > { %v652_v58 = vadd.s32 %v651_v57, %v650_v56 }
 0x59f   : > { %1744 = vpush %v652_v58 }
 0x5d0   : > { %s1745_s18 = spop %1744 }
 0x5d1   : > { %p654_p11 = scmp.ge.s32.totalorder %s1745_s18, %s2498_s27 }
 0x5d3   : > { %s2510_s17 = smov (!%p654_p11, %s623_s17), %s2508_s13 }
 0x5d4   : > { %s656_s19 = sor.u32 8388608, %s2510_s17 }
 0x5d5   : > { %v657_v59 = vstv %s656_s19 }
 0x5d6   : > { %vm658_vm12 = vcmp.ge.s32.totalorder %v1962_v43, %v657_v59 }
 0x5d7   : > { %v659_v60 = vsel %vm658_vm12, 1, %v1837_v4 }
 0x5d8   : > { %v660_v61 = vperm.slane %v659_v60, 0  ;;  %v661_v62 = vperm.slane %v659_v60, 1  ;;  %v662_v63 = vperm.slane %v659_v60, 2 }
 0x5da   : > { %v663_v6 = vsel %vm362_vm1, %v660_v61, 0  ;;  %v664_v10 = vsel %vm362_vm1, %v661_v62, 0  ;;  %v665_v12 = vsel %vm362_vm1, %v662_v63, 0 }
 0x5db   : > { %v666_v11 = vadd.s32 %v664_v10, %v663_v6 }
 0x5dd   : > { %v667_v13 = vadd.s32 %v666_v11, %v665_v12 }
 0x5df   : > { %v669_v14 = vshrl.u32 %v667_v13, 16  ;;  %v668_v15 = vand.u32 65535, %v667_v13 }
 0x5e1   : > { %v671_v16 = vcvt.s32.f32 %v669_v14  ;;  %v670_v17 = vcvt.s32.f32 %v668_v15 }
 0x5e3   : > { %674 = vadd.xlane.f32.xlu0 %v671_v16  ;;  %672 = vadd.xlane.f32.xlu1 %v670_v17 }
 0x656   : > { %v675_v18 = vpop.xlane.xlu0 %674  ;;  %v673_v19 = vpop.xlane.xlu1 %672 }
 0x657   : > { %v677_v20 = vcvt.f32.s32 %v675_v18  ;;  %v676_v22 = vcvt.f32.s32 %v673_v19 }
 0x659   : > { %v678_v21 = vshll.u32 %v677_v20, 16 }
 0x65b   : > { %v679_v24 = vadd.s32 %v678_v21, %v676_v22 }
 0x65d   : > { %v680_v27 = vrot.slane %v679_v24, 4 }
 0x65f   : > { %v681_v28 = vadd.s32 %v680_v27, %v679_v24 }
 0x661   : > { %v682_v29 = vrot.slane %v681_v28, 2 }
 0x663   : > { %v683_v30 = vadd.s32 %v682_v29, %v681_v28 }
 0x665   : > { %v684_v31 = vrot.slane %v683_v30, 1 }
 0x667   : > { %v685_v32 = vadd.s32 %v684_v31, %v683_v30 }
 0x669   : > { %1746 = vpush %v685_v32 }
 0x69a   : > { %s1747_s20 = spop %1746 }
 0x69b   : > { %p687_p12 = scmp.ge.s32.totalorder %s1747_s20, %s2498_s27 }
 0x69d   : > { %s2512_s19 = smov (!%p687_p12, %s656_s19), %s2510_s17 }
 0x69e   : > { %s689_s22 = sor.u32 4194304, %s2512_s19 }
 0x69f   : > { %v690_v34 = vstv %s689_s22 }
 0x6a0   : > { %vm691_vm13 = vcmp.ge.s32.totalorder %v1962_v43, %v690_v34 }
 0x6a1   : > { %v692_v37 = vsel %vm691_vm13, 1, %v1837_v4 }
 0x6a2   : > { %v693_v38 = vperm.slane %v692_v37, 0  ;;  %v694_v41 = vperm.slane %v692_v37, 1  ;;  %v695_v1 = vperm.slane %v692_v37, 2 }
 0x6a4   : > { %v696_v2 = vsel %vm362_vm1, %v693_v38, 0  ;;  %v697_v44 = vsel %vm362_vm1, %v694_v41, 0  ;;  %v698_v46 = vsel %vm362_vm1, %v695_v1, 0 }
 0x6a5   : > { %v699_v45 = vadd.s32 %v697_v44, %v696_v2 }
 0x6a7   : > { %v700_v47 = vadd.s32 %v699_v45, %v698_v46 }
 0x6a9   : > { %v702_v48 = vshrl.u32 %v700_v47, 16  ;;  %v701_v49 = vand.u32 65535, %v700_v47 }
 0x6ab   : > { %v704_v50 = vcvt.s32.f32 %v702_v48  ;;  %v703_v51 = vcvt.s32.f32 %v701_v49 }
 0x6ad   : > { %707 = vadd.xlane.f32.xlu2 %v704_v50  ;;  %705 = vadd.xlane.f32.xlu0 %v703_v51 }
 0x720   : > { %v708_v52 = vpop.xlane.xlu2 %707  ;;  %v706_v53 = vpop.xlane.xlu0 %705 }
 0x721   : > { %v710_v54 = vcvt.f32.s32 %v708_v52  ;;  %v709_v56 = vcvt.f32.s32 %v706_v53 }
 0x723   : > { %v711_v55 = vshll.u32 %v710_v54, 16 }
 0x725   : > { %v712_v57 = vadd.s32 %v711_v55, %v709_v56 }
 0x727   : > { %v713_v58 = vrot.slane %v712_v57, 4 }
 0x729   : > { %v714_v59 = vadd.s32 %v713_v58, %v712_v57 }
 0x72b   : > { %v715_v60 = vrot.slane %v714_v59, 2 }
 0x72d   : > { %v716_v61 = vadd.s32 %v715_v60, %v714_v59 }
 0x72f   : > { %v717_v62 = vrot.slane %v716_v61, 1 }
 0x731   : > { %v718_v63 = vadd.s32 %v717_v62, %v716_v61 }
 0x733   : > { %1748 = vpush %v718_v63 }
 0x764   : > { %s1749_s23 = spop %1748 }
 0x765   : > { %p720_p13 = scmp.ge.s32.totalorder %s1749_s23, %s2498_s27 }
 0x767   : > { %s2514_s22 = smov (!%p720_p13, %s689_s22), %s2512_s19 }
 0x768   : > { %s722_s25 = sor.u32 2097152, %s2514_s22 }
 0x769   : > { %v723_v6 = vstv %s722_s25 }
 0x76a   : > { %vm724_vm14 = vcmp.ge.s32.totalorder %v1962_v43, %v723_v6 }
 0x76b   : > { %v725_v10 = vsel %vm724_vm14, 1, %v1837_v4 }
 0x76c   : > { %v726_v11 = vperm.slane %v725_v10, 0  ;;  %v727_v12 = vperm.slane %v725_v10, 1  ;;  %v728_v13 = vperm.slane %v725_v10, 2 }
 0x76e   : > { %v729_v14 = vsel %vm362_vm1, %v726_v11, 0  ;;  %v730_v15 = vsel %vm362_vm1, %v727_v12, 0  ;;  %v731_v17 = vsel %vm362_vm1, %v728_v13, 0 }
 0x76f   : > { %v732_v16 = vadd.s32 %v730_v15, %v729_v14 }
 0x771   : > { %v733_v18 = vadd.s32 %v732_v16, %v731_v17 }
 0x773   : > { %v735_v19 = vshrl.u32 %v733_v18, 16  ;;  %v734_v20 = vand.u32 65535, %v733_v18 }
 0x775   : > { %v737_v21 = vcvt.s32.f32 %v735_v19  ;;  %v736_v22 = vcvt.s32.f32 %v734_v20 }
 0x777   : > { %740 = vadd.xlane.f32.xlu1 %v737_v21  ;;  %738 = vadd.xlane.f32.xlu2 %v736_v22 }
 0x7ea   : > { %v741_v24 = vpop.xlane.xlu1 %740  ;;  %v739_v27 = vpop.xlane.xlu2 %738 }
 0x7eb   : > { %v743_v28 = vcvt.f32.s32 %v741_v24  ;;  %v742_v30 = vcvt.f32.s32 %v739_v27 }
 0x7ed   : > { %v744_v29 = vshll.u32 %v743_v28, 16 }
 0x7ef   : > { %v745_v31 = vadd.s32 %v744_v29, %v742_v30 }
 0x7f1   : > { %v746_v32 = vrot.slane %v745_v31, 4 }
 0x7f3   : > { %v747_v34 = vadd.s32 %v746_v32, %v745_v31 }
 0x7f5   : > { %v748_v37 = vrot.slane %v747_v34, 2 }
 0x7f7   : > { %v749_v38 = vadd.s32 %v748_v37, %v747_v34 }
 0x7f9   : > { %v750_v41 = vrot.slane %v749_v38, 1 }
 0x7fb   : > { %v751_v1 = vadd.s32 %v750_v41, %v749_v38 }
 0x7fd   : > { %1750 = vpush %v751_v1 }
 0x82e   : > { %s1751_s26 = spop %1750 }
 0x82f   : > { %p753_p0 = scmp.ge.s32.totalorder %s1751_s26, %s2498_s27 }
 0x831   : > { %s2516_s25 = smov (!%p753_p0, %s722_s25), %s2514_s22 }
 0x832   : > { %s755_s28 = sor.u32 1048576, %s2516_s25 }
 0x833   : > { %v756_v2 = vstv %s755_s28 }
 0x834   : > { %vm757_vm15 = vcmp.ge.s32.totalorder %v1962_v43, %v756_v2 }
 0x835   : > { %v758_v44 = vsel %vm757_vm15, 1, %v1837_v4 }
 0x836   : > { %v759_v45 = vperm.slane %v758_v44, 0  ;;  %v760_v46 = vperm.slane %v758_v44, 1  ;;  %v761_v47 = vperm.slane %v758_v44, 2 }
 0x838   : > { %v762_v48 = vsel %vm362_vm1, %v759_v45, 0  ;;  %v763_v49 = vsel %vm362_vm1, %v760_v46, 0  ;;  %v764_v51 = vsel %vm362_vm1, %v761_v47, 0 }
 0x839   : > { %v765_v50 = vadd.s32 %v763_v49, %v762_v48 }
 0x83b   : > { %v766_v52 = vadd.s32 %v765_v50, %v764_v51 }
 0x83d   : > { %v768_v53 = vshrl.u32 %v766_v52, 16  ;;  %v767_v54 = vand.u32 65535, %v766_v52 }
 0x83f   : > { %v770_v55 = vcvt.s32.f32 %v768_v53  ;;  %v769_v56 = vcvt.s32.f32 %v767_v54 }
 0x841   : > { %773 = vadd.xlane.f32.xlu0 %v770_v55  ;;  %771 = vadd.xlane.f32.xlu1 %v769_v56 }
 0x8b4   : > { %v774_v57 = vpop.xlane.xlu0 %773  ;;  %v772_v58 = vpop.xlane.xlu1 %771 }
 0x8b5   : > { %v776_v59 = vcvt.f32.s32 %v774_v57  ;;  %v775_v61 = vcvt.f32.s32 %v772_v58 }
 0x8b7   : > { %v777_v60 = vshll.u32 %v776_v59, 16 }
 0x8b9   : > { %v778_v62 = vadd.s32 %v777_v60, %v775_v61 }
 0x8bb   : > { %v779_v63 = vrot.slane %v778_v62, 4 }
 0x8bd   : > { %v780_v6 = vadd.s32 %v779_v63, %v778_v62 }
 0x8bf   : > { %v781_v10 = vrot.slane %v780_v6, 2 }
 0x8c1   : > { %v782_v11 = vadd.s32 %v781_v10, %v780_v6 }
 0x8c3   : > { %v783_v12 = vrot.slane %v782_v11, 1 }
 0x8c5   : > { %v784_v13 = vadd.s32 %v783_v12, %v782_v11 }
 0x8c7   : > { %1752 = vpush %v784_v13 }
 0x8f8   : > { %s1753_s29 = spop %1752 }
 0x8f9   : > { %p786_p1 = scmp.ge.s32.totalorder %s1753_s29, %s2498_s27 }
 0x8fb   : > { %s2518_s28 = smov (!%p786_p1, %s755_s28), %s2516_s25 }
 0x8fc   : > { %s788_s30 = sor.u32 524288, %s2518_s28 }
 0x8fd   : > { %v789_v14 = vstv %s788_s30 }
 0x8fe   : > { %vm790_vm2 = vcmp.ge.s32.totalorder %v1962_v43, %v789_v14 }
 0x8ff   : > { %v791_v15 = vsel %vm790_vm2, 1, %v1837_v4 }
 0x900   : > { %v792_v16 = vperm.slane %v791_v15, 0  ;;  %v793_v17 = vperm.slane %v791_v15, 1  ;;  %v794_v18 = vperm.slane %v791_v15, 2 }
 0x902   : > { %v795_v19 = vsel %vm362_vm1, %v792_v16, 0  ;;  %v796_v20 = vsel %vm362_vm1, %v793_v17, 0  ;;  %v797_v22 = vsel %vm362_vm1, %v794_v18, 0 }
 0x903   : > { %v798_v21 = vadd.s32 %v796_v20, %v795_v19 }
 0x905   : > { %v799_v24 = vadd.s32 %v798_v21, %v797_v22 }
 0x907   : > { %v801_v27 = vshrl.u32 %v799_v24, 16  ;;  %v800_v28 = vand.u32 65535, %v799_v24 }
 0x909   : > { %v803_v29 = vcvt.s32.f32 %v801_v27  ;;  %v802_v30 = vcvt.s32.f32 %v800_v28 }
 0x90b   : > { %806 = vadd.xlane.f32.xlu2 %v803_v29  ;;  %804 = vadd.xlane.f32.xlu0 %v802_v30 }
 0x97e   : > { %v807_v31 = vpop.xlane.xlu2 %806  ;;  %v805_v32 = vpop.xlane.xlu0 %804 }
 0x97f   : > { %v809_v34 = vcvt.f32.s32 %v807_v31  ;;  %v808_v38 = vcvt.f32.s32 %v805_v32 }
 0x981   : > { %v810_v37 = vshll.u32 %v809_v34, 16 }
 0x983   : > { %v811_v41 = vadd.s32 %v810_v37, %v808_v38 }
 0x985   : > { %v812_v1 = vrot.slane %v811_v41, 4 }
 0x987   : > { %v813_v2 = vadd.s32 %v812_v1, %v811_v41 }
 0x989   : > { %v814_v44 = vrot.slane %v813_v2, 2 }
 0x98b   : > { %v815_v45 = vadd.s32 %v814_v44, %v813_v2 }
 0x98d   : > { %v816_v46 = vrot.slane %v815_v45, 1 }
 0x98f   : > { %v817_v47 = vadd.s32 %v816_v46, %v815_v45 }
 0x991   : > { %1754 = vpush %v817_v47 }
 0x9c2   : > { %s1755_s5 = spop %1754 }
 0x9c3   : > { %p819_p2 = scmp.ge.s32.totalorder %s1755_s5, %s2498_s27 }
 0x9c5   : > { %s2520_s30 = smov (!%p819_p2, %s788_s30), %s2518_s28 }
 0x9c6   : > { %s821_s6 = sor.u32 262144, %s2520_s30 }
 0x9c7   : > { %v822_v48 = vstv %s821_s6 }
 0x9c8   : > { %vm823_vm4 = vcmp.ge.s32.totalorder %v1962_v43, %v822_v48 }
 0x9c9   : > { %v824_v49 = vsel %vm823_vm4, 1, %v1837_v4 }
 0x9ca   : > { %v825_v50 = vperm.slane %v824_v49, 0  ;;  %v826_v51 = vperm.slane %v824_v49, 1  ;;  %v827_v52 = vperm.slane %v824_v49, 2 }
 0x9cc   : > { %v828_v53 = vsel %vm362_vm1, %v825_v50, 0  ;;  %v829_v54 = vsel %vm362_vm1, %v826_v51, 0  ;;  %v830_v56 = vsel %vm362_vm1, %v827_v52, 0 }
 0x9cd   : > { %v831_v55 = vadd.s32 %v829_v54, %v828_v53 }
 0x9cf   : > { %v832_v57 = vadd.s32 %v831_v55, %v830_v56 }
 0x9d1   : > { %v834_v58 = vshrl.u32 %v832_v57, 16  ;;  %v833_v59 = vand.u32 65535, %v832_v57 }
 0x9d3   : > { %v836_v60 = vcvt.s32.f32 %v834_v58  ;;  %v835_v61 = vcvt.s32.f32 %v833_v59 }
 0x9d5   : > { %839 = vadd.xlane.f32.xlu1 %v836_v60  ;;  %837 = vadd.xlane.f32.xlu2 %v835_v61 }
 0xa48   : > { %v840_v62 = vpop.xlane.xlu1 %839  ;;  %v838_v63 = vpop.xlane.xlu2 %837 }
 0xa49   : > { %v842_v6 = vcvt.f32.s32 %v840_v62  ;;  %v841_v11 = vcvt.f32.s32 %v838_v63 }
 0xa4b   : > { %v843_v10 = vshll.u32 %v842_v6, 16 }
 0xa4d   : > { %v844_v12 = vadd.s32 %v843_v10, %v841_v11 }
 0xa4f   : > { %v845_v13 = vrot.slane %v844_v12, 4 }
 0xa51   : > { %v846_v14 = vadd.s32 %v845_v13, %v844_v12 }
 0xa53   : > { %v847_v15 = vrot.slane %v846_v14, 2 }
 0xa55   : > { %v848_v16 = vadd.s32 %v847_v15, %v846_v14 }
 0xa57   : > { %v849_v17 = vrot.slane %v848_v16, 1 }
 0xa59   : > { %v850_v18 = vadd.s32 %v849_v17, %v848_v16 }
 0xa5b   : > { %1756 = vpush %v850_v18 }
 0xa8c   : > { %s1757_s7 = spop %1756 }
 0xa8d   : > { %p852_p3 = scmp.ge.s32.totalorder %s1757_s7, %s2498_s27 }
 0xa8f   : > { %s2522_s6 = smov (!%p852_p3, %s821_s6), %s2520_s30 }
 0xa90   : > { %s854_s8 = sor.u32 131072, %s2522_s6 }
 0xa91   : > { %v855_v19 = vstv %s854_s8 }
 0xa92   : > { %vm856_vm5 = vcmp.ge.s32.totalorder %v1962_v43, %v855_v19 }
 0xa93   : > { %v857_v20 = vsel %vm856_vm5, 1, %v1837_v4 }
 0xa94   : > { %v858_v21 = vperm.slane %v857_v20, 0  ;;  %v859_v22 = vperm.slane %v857_v20, 1  ;;  %v860_v24 = vperm.slane %v857_v20, 2 }
 0xa96   : > { %v861_v27 = vsel %vm362_vm1, %v858_v21, 0  ;;  %v862_v28 = vsel %vm362_vm1, %v859_v22, 0  ;;  %v863_v30 = vsel %vm362_vm1, %v860_v24, 0 }
 0xa97   : > { %v864_v29 = vadd.s32 %v862_v28, %v861_v27 }
 0xa99   : > { %v865_v31 = vadd.s32 %v864_v29, %v863_v30 }
 0xa9b   : > { %v867_v32 = vshrl.u32 %v865_v31, 16  ;;  %v866_v34 = vand.u32 65535, %v865_v31 }
 0xa9d   : > { %v869_v37 = vcvt.s32.f32 %v867_v32  ;;  %v868_v38 = vcvt.s32.f32 %v866_v34 }
 0xa9f   : > { %872 = vadd.xlane.f32.xlu0 %v869_v37  ;;  %870 = vadd.xlane.f32.xlu1 %v868_v38 }
 0xb12   : > { %v873_v41 = vpop.xlane.xlu0 %872  ;;  %v871_v1 = vpop.xlane.xlu1 %870 }
 0xb13   : > { %v875_v2 = vcvt.f32.s32 %v873_v41  ;;  %v874_v45 = vcvt.f32.s32 %v871_v1 }
 0xb15   : > { %v876_v44 = vshll.u32 %v875_v2, 16 }
 0xb17   : > { %v877_v46 = vadd.s32 %v876_v44, %v874_v45 }
 0xb19   : > { %v878_v47 = vrot.slane %v877_v46, 4 }
 0xb1b   : > { %v879_v48 = vadd.s32 %v878_v47, %v877_v46 }
 0xb1d   : > { %v880_v49 = vrot.slane %v879_v48, 2 }
 0xb1f   : > { %v881_v50 = vadd.s32 %v880_v49, %v879_v48 }
 0xb21   : > { %v882_v51 = vrot.slane %v881_v50, 1 }
 0xb23   : > { %v883_v52 = vadd.s32 %v882_v51, %v881_v50 }
 0xb25   : > { %1758 = vpush %v883_v52 }
 0xb56   : > { %s1759_s9 = spop %1758 }
 0xb57   : > { %p885_p4 = scmp.ge.s32.totalorder %s1759_s9, %s2498_s27 }
 0xb59   : > { %s2524_s8 = smov (!%p885_p4, %s854_s8), %s2522_s6 }
 0xb5a   : > { %s887_s10 = sor.u32 65536, %s2524_s8 }
 0xb5b   : > { %v888_v53 = vstv %s887_s10 }
 0xb5c   : > { %vm889_vm6 = vcmp.ge.s32.totalorder %v1962_v43, %v888_v53 }
 0xb5d   : > { %v890_v54 = vsel %vm889_vm6, 1, %v1837_v4 }
 0xb5e   : > { %v891_v55 = vperm.slane %v890_v54, 0  ;;  %v892_v56 = vperm.slane %v890_v54, 1  ;;  %v893_v57 = vperm.slane %v890_v54, 2 }
 0xb60   : > { %v894_v58 = vsel %vm362_vm1, %v891_v55, 0  ;;  %v895_v59 = vsel %vm362_vm1, %v892_v56, 0  ;;  %v896_v61 = vsel %vm362_vm1, %v893_v57, 0 }
 0xb61   : > { %v897_v60 = vadd.s32 %v895_v59, %v894_v58 }
 0xb63   : > { %v898_v62 = vadd.s32 %v897_v60, %v896_v61 }
 0xb65   : > { %v900_v63 = vshrl.u32 %v898_v62, 16  ;;  %v899_v6 = vand.u32 65535, %v898_v62 }
 0xb67   : > { %v902_v10 = vcvt.s32.f32 %v900_v63  ;;  %v901_v11 = vcvt.s32.f32 %v899_v6 }
 0xb69   : > { %905 = vadd.xlane.f32.xlu2 %v902_v10  ;;  %903 = vadd.xlane.f32.xlu0 %v901_v11 }
 0xbdc   : > { %v906_v12 = vpop.xlane.xlu2 %905  ;;  %v904_v13 = vpop.xlane.xlu0 %903 }
 0xbdd   : > { %v908_v14 = vcvt.f32.s32 %v906_v12  ;;  %v907_v16 = vcvt.f32.s32 %v904_v13 }
 0xbdf   : > { %v909_v15 = vshll.u32 %v908_v14, 16 }
 0xbe1   : > { %v910_v17 = vadd.s32 %v909_v15, %v907_v16 }
 0xbe3   : > { %v911_v18 = vrot.slane %v910_v17, 4 }
 0xbe5   : > { %v912_v19 = vadd.s32 %v911_v18, %v910_v17 }
 0xbe7   : > { %v913_v20 = vrot.slane %v912_v19, 2 }
 0xbe9   : > { %v914_v21 = vadd.s32 %v913_v20, %v912_v19 }
 0xbeb   : > { %v915_v22 = vrot.slane %v914_v21, 1 }
 0xbed   : > { %v916_v24 = vadd.s32 %v915_v22, %v914_v21 }
 0xbef   : > { %1760 = vpush %v916_v24 }
 0xc20   : > { %s1761_s11 = spop %1760 }
 0xc21   : > { %p918_p5 = scmp.ge.s32.totalorder %s1761_s11, %s2498_s27 }
 0xc23   : > { %s2526_s10 = smov (!%p918_p5, %s887_s10), %s2524_s8 }
 0xc24   : > { %s920_s12 = sor.u32 32768, %s2526_s10 }
 0xc25   : > { %v921_v27 = vstv %s920_s12 }
 0xc26   : > { %vm922_vm7 = vcmp.ge.s32.totalorder %v1962_v43, %v921_v27 }
 0xc27   : > { %v923_v28 = vsel %vm922_vm7, 1, %v1837_v4 }
 0xc28   : > { %v924_v29 = vperm.slane %v923_v28, 0  ;;  %v925_v30 = vperm.slane %v923_v28, 1  ;;  %v926_v31 = vperm.slane %v923_v28, 2 }
 0xc2a   : > { %v927_v32 = vsel %vm362_vm1, %v924_v29, 0  ;;  %v928_v34 = vsel %vm362_vm1, %v925_v30, 0  ;;  %v929_v38 = vsel %vm362_vm1, %v926_v31, 0 }
 0xc2b   : > { %v930_v37 = vadd.s32 %v928_v34, %v927_v32 }
 0xc2d   : > { %v931_v41 = vadd.s32 %v930_v37, %v929_v38 }
 0xc2f   : > { %v933_v1 = vshrl.u32 %v931_v41, 16  ;;  %v932_v2 = vand.u32 65535, %v931_v41 }
 0xc31   : > { %v935_v44 = vcvt.s32.f32 %v933_v1  ;;  %v934_v45 = vcvt.s32.f32 %v932_v2 }
 0xc33   : > { %938 = vadd.xlane.f32.xlu1 %v935_v44  ;;  %936 = vadd.xlane.f32.xlu2 %v934_v45 }
 0xca6   : > { %v939_v46 = vpop.xlane.xlu1 %938  ;;  %v937_v47 = vpop.xlane.xlu2 %936 }
 0xca7   : > { %v941_v48 = vcvt.f32.s32 %v939_v46  ;;  %v940_v50 = vcvt.f32.s32 %v937_v47 }
 0xca9   : > { %v942_v49 = vshll.u32 %v941_v48, 16 }
 0xcab   : > { %v943_v51 = vadd.s32 %v942_v49, %v940_v50 }
 0xcad   : > { %v944_v52 = vrot.slane %v943_v51, 4 }
 0xcaf   : > { %v945_v53 = vadd.s32 %v944_v52, %v943_v51 }
 0xcb1   : > { %v946_v54 = vrot.slane %v945_v53, 2 }
 0xcb3   : > { %v947_v55 = vadd.s32 %v946_v54, %v945_v53 }
 0xcb5   : > { %v948_v56 = vrot.slane %v947_v55, 1 }
 0xcb7   : > { %v949_v57 = vadd.s32 %v948_v56, %v947_v55 }
 0xcb9   : > { %1762 = vpush %v949_v57 }
 0xcea   : > { %s1763_s13 = spop %1762 }
 0xceb   : > { %p951_p6 = scmp.ge.s32.totalorder %s1763_s13, %s2498_s27 }
 0xced   : > { %s2528_s12 = smov (!%p951_p6, %s920_s12), %s2526_s10 }
 0xcee   : > { %s953_s14 = sor.u32 16384, %s2528_s12 }
 0xcef   : > { %v954_v58 = vstv %s953_s14 }
 0xcf0   : > { %vm955_vm8 = vcmp.ge.s32.totalorder %v1962_v43, %v954_v58 }
 0xcf1   : > { %v956_v59 = vsel %vm955_vm8, 1, %v1837_v4 }
 0xcf2   : > { %v957_v60 = vperm.slane %v956_v59, 0  ;;  %v958_v61 = vperm.slane %v956_v59, 1  ;;  %v959_v62 = vperm.slane %v956_v59, 2 }
 0xcf4   : > { %v960_v63 = vsel %vm362_vm1, %v957_v60, 0  ;;  %v961_v6 = vsel %vm362_vm1, %v958_v61, 0  ;;  %v962_v11 = vsel %vm362_vm1, %v959_v62, 0 }
 0xcf5   : > { %v963_v10 = vadd.s32 %v961_v6, %v960_v63 }
 0xcf7   : > { %v964_v12 = vadd.s32 %v963_v10, %v962_v11 }
 0xcf9   : > { %v966_v13 = vshrl.u32 %v964_v12, 16  ;;  %v965_v14 = vand.u32 65535, %v964_v12 }
 0xcfb   : > { %v968_v15 = vcvt.s32.f32 %v966_v13  ;;  %v967_v16 = vcvt.s32.f32 %v965_v14 }
 0xcfd   : > { %971 = vadd.xlane.f32.xlu0 %v968_v15  ;;  %969 = vadd.xlane.f32.xlu1 %v967_v16 }
 0xd70   : > { %v972_v17 = vpop.xlane.xlu0 %971  ;;  %v970_v18 = vpop.xlane.xlu1 %969 }
 0xd71   : > { %v974_v19 = vcvt.f32.s32 %v972_v17  ;;  %v973_v21 = vcvt.f32.s32 %v970_v18 }
 0xd73   : > { %v975_v20 = vshll.u32 %v974_v19, 16 }
 0xd75   : > { %v976_v22 = vadd.s32 %v975_v20, %v973_v21 }
 0xd77   : > { %v977_v24 = vrot.slane %v976_v22, 4 }
 0xd79   : > { %v978_v27 = vadd.s32 %v977_v24, %v976_v22 }
 0xd7b   : > { %v979_v28 = vrot.slane %v978_v27, 2 }
 0xd7d   : > { %v980_v29 = vadd.s32 %v979_v28, %v978_v27 }
 0xd7f   : > { %v981_v30 = vrot.slane %v980_v29, 1 }
 0xd81   : > { %v982_v31 = vadd.s32 %v981_v30, %v980_v29 }
 0xd83   : > { %1764 = vpush %v982_v31 }
 0xdb4   : > { %s1765_s17 = spop %1764 }
 0xdb5   : > { %p984_p7 = scmp.ge.s32.totalorder %s1765_s17, %s2498_s27 }
 0xdb7   : > { %s2530_s14 = smov (!%p984_p7, %s953_s14), %s2528_s12 }
 0xdb8   : > { %s986_s18 = sor.u32 8192, %s2530_s14 }
 0xdb9   : > { %v987_v32 = vstv %s986_s18 }
 0xdba   : > { %vm988_vm9 = vcmp.ge.s32.totalorder %v1962_v43, %v987_v32 }
 0xdbb   : > { %v989_v34 = vsel %vm988_vm9, 1, %v1837_v4 }
 0xdbc   : > { %v990_v37 = vperm.slane %v989_v34, 0  ;;  %v991_v38 = vperm.slane %v989_v34, 1  ;;  %v992_v41 = vperm.slane %v989_v34, 2 }
 0xdbe   : > { %v993_v1 = vsel %vm362_vm1, %v990_v37, 0  ;;  %v994_v2 = vsel %vm362_vm1, %v991_v38, 0  ;;  %v995_v45 = vsel %vm362_vm1, %v992_v41, 0 }
 0xdbf   : > { %v996_v44 = vadd.s32 %v994_v2, %v993_v1 }
 0xdc1   : > { %v997_v46 = vadd.s32 %v996_v44, %v995_v45 }
 0xdc3   : > { %v999_v47 = vshrl.u32 %v997_v46, 16  ;;  %v998_v48 = vand.u32 65535, %v997_v46 }
 0xdc5   : > { %v1001_v49 = vcvt.s32.f32 %v999_v47  ;;  %v1000_v50 = vcvt.s32.f32 %v998_v48 }
 0xdc7   : > { %1004 = vadd.xlane.f32.xlu2 %v1001_v49  ;;  %1002 = vadd.xlane.f32.xlu0 %v1000_v50 }
 0xe3a   : > { %v1005_v51 = vpop.xlane.xlu2 %1004  ;;  %v1003_v52 = vpop.xlane.xlu0 %1002 }
 0xe3b   : > { %v1007_v53 = vcvt.f32.s32 %v1005_v51  ;;  %v1006_v55 = vcvt.f32.s32 %v1003_v52 }
 0xe3d   : > { %v1008_v54 = vshll.u32 %v1007_v53, 16 }
 0xe3f   : > { %v1009_v56 = vadd.s32 %v1008_v54, %v1006_v55 }
 0xe41   : > { %v1010_v57 = vrot.slane %v1009_v56, 4 }
 0xe43   : > { %v1011_v58 = vadd.s32 %v1010_v57, %v1009_v56 }
 0xe45   : > { %v1012_v59 = vrot.slane %v1011_v58, 2 }
 0xe47   : > { %v1013_v60 = vadd.s32 %v1012_v59, %v1011_v58 }
 0xe49   : > { %v1014_v61 = vrot.slane %v1013_v60, 1 }
 0xe4b   : > { %v1015_v62 = vadd.s32 %v1014_v61, %v1013_v60 }
 0xe4d   : > { %1766 = vpush %v1015_v62 }
 0xe7e   : > { %s1767_s19 = spop %1766 }
 0xe7f   : > { %p1017_p8 = scmp.ge.s32.totalorder %s1767_s19, %s2498_s27 }
 0xe81   : > { %s2532_s18 = smov (!%p1017_p8, %s986_s18), %s2530_s14  ;;  %p1524_p8 = scmp.gt.s32.totalorder %s2498_s27, 0 }
 0xe82   : > { %s1019_s20 = sor.u32 4096, %s2532_s18 }
 0xe83   : > { %v1020_v63 = vstv %s1019_s20 }
 0xe84   : > { %vm1021_vm10 = vcmp.ge.s32.totalorder %v1962_v43, %v1020_v63 }
 0xe85   : > { %v1022_v6 = vsel %vm1021_vm10, 1, %v1837_v4 }
 0xe86   : > { %v1023_v10 = vperm.slane %v1022_v6, 0  ;;  %v1024_v11 = vperm.slane %v1022_v6, 1  ;;  %v1025_v12 = vperm.slane %v1022_v6, 2 }
 0xe88   : > { %v1026_v13 = vsel %vm362_vm1, %v1023_v10, 0  ;;  %v1027_v14 = vsel %vm362_vm1, %v1024_v11, 0  ;;  %v1028_v16 = vsel %vm362_vm1, %v1025_v12, 0 }
 0xe89   : > { %v1029_v15 = vadd.s32 %v1027_v14, %v1026_v13 }
 0xe8b   : > { %v1030_v17 = vadd.s32 %v1029_v15, %v1028_v16 }
 0xe8d   : > { %v1032_v18 = vshrl.u32 %v1030_v17, 16  ;;  %v1031_v19 = vand.u32 65535, %v1030_v17 }
 0xe8f   : > { %v1034_v20 = vcvt.s32.f32 %v1032_v18  ;;  %v1033_v21 = vcvt.s32.f32 %v1031_v19 }
 0xe91   : > { %1037 = vadd.xlane.f32.xlu1 %v1034_v20  ;;  %1035 = vadd.xlane.f32.xlu2 %v1033_v21 }
 0xf04   : > { %v1038_v22 = vpop.xlane.xlu1 %1037  ;;  %v1036_v24 = vpop.xlane.xlu2 %1035 }
 0xf05   : > { %v1040_v27 = vcvt.f32.s32 %v1038_v22  ;;  %v1039_v29 = vcvt.f32.s32 %v1036_v24 }
 0xf07   : > { %v1041_v28 = vshll.u32 %v1040_v27, 16 }
 0xf09   : > { %v1042_v30 = vadd.s32 %v1041_v28, %v1039_v29 }
 0xf0b   : > { %v1043_v31 = vrot.slane %v1042_v30, 4 }
 0xf0d   : > { %v1044_v32 = vadd.s32 %v1043_v31, %v1042_v30 }
 0xf0f   : > { %v1045_v34 = vrot.slane %v1044_v32, 2 }
 0xf11   : > { %v1046_v37 = vadd.s32 %v1045_v34, %v1044_v32 }
 0xf13   : > { %v1047_v38 = vrot.slane %v1046_v37, 1 }
 0xf15   : > { %v1048_v41 = vadd.s32 %v1047_v38, %v1046_v37 }
 0xf17   : > { %1768 = vpush %v1048_v41 }
 0xf48   : > { %s1769_s22 = spop %1768 }
 0xf49   : > { %p1050_p9 = scmp.ge.s32.totalorder %s1769_s22, %s2498_s27 }
 0xf4b   : > { %s2534_s20 = smov (!%p1050_p9, %s1019_s20), %s2532_s18 }
 0xf4c   : > { %s1052_s23 = sor.u32 2048, %s2534_s20 }
 0xf4d   : > { %v1053_v1 = vstv %s1052_s23 }
 0xf4e   : > { %vm1054_vm11 = vcmp.ge.s32.totalorder %v1962_v43, %v1053_v1 }
 0xf4f   : > { %v1055_v2 = vsel %vm1054_vm11, 1, %v1837_v4 }
 0xf50   : > { %v1056_v44 = vperm.slane %v1055_v2, 0  ;;  %v1057_v45 = vperm.slane %v1055_v2, 1  ;;  %v1058_v46 = vperm.slane %v1055_v2, 2 }
 0xf52   : > { %v1059_v47 = vsel %vm362_vm1, %v1056_v44, 0  ;;  %v1060_v48 = vsel %vm362_vm1, %v1057_v45, 0  ;;  %v1061_v50 = vsel %vm362_vm1, %v1058_v46, 0 }
 0xf53   : > { %v1062_v49 = vadd.s32 %v1060_v48, %v1059_v47 }
 0xf55   : > { %v1063_v51 = vadd.s32 %v1062_v49, %v1061_v50 }
 0xf57   : > { %v1065_v52 = vshrl.u32 %v1063_v51, 16  ;;  %v1064_v53 = vand.u32 65535, %v1063_v51 }
 0xf59   : > { %v1067_v54 = vcvt.s32.f32 %v1065_v52  ;;  %v1066_v55 = vcvt.s32.f32 %v1064_v53 }
 0xf5b   : > { %1070 = vadd.xlane.f32.xlu0 %v1067_v54  ;;  %1068 = vadd.xlane.f32.xlu1 %v1066_v55 }
 0xfce   : > { %v1071_v56 = vpop.xlane.xlu0 %1070  ;;  %v1069_v57 = vpop.xlane.xlu1 %1068 }
 0xfcf   : > { %v1073_v58 = vcvt.f32.s32 %v1071_v56  ;;  %v1072_v60 = vcvt.f32.s32 %v1069_v57 }
 0xfd1   : > { %v1074_v59 = vshll.u32 %v1073_v58, 16 }
 0xfd3   : > { %v1075_v61 = vadd.s32 %v1074_v59, %v1072_v60 }
 0xfd5   : > { %v1076_v62 = vrot.slane %v1075_v61, 4 }
 0xfd7   : > { %v1077_v63 = vadd.s32 %v1076_v62, %v1075_v61 }
 0xfd9   : > { %v1078_v6 = vrot.slane %v1077_v63, 2 }
 0xfdb   : > { %v1079_v10 = vadd.s32 %v1078_v6, %v1077_v63 }
 0xfdd   : > { %v1080_v11 = vrot.slane %v1079_v10, 1 }
 0xfdf   : > { %v1081_v12 = vadd.s32 %v1080_v11, %v1079_v10 }
 0xfe1   : > { %1770 = vpush %v1081_v12 }
0x1012   : > { %s1771_s25 = spop %1770 }
0x1013   : > { %p1083_p10 = scmp.ge.s32.totalorder %s1771_s25, %s2498_s27 }
0x1015   : > { %s2536_s23 = smov (!%p1083_p10, %s1052_s23), %s2534_s20 }
0x1016   : > { %s1085_s26 = sor.u32 1024, %s2536_s23 }
0x1017   : > { %v1086_v13 = vstv %s1085_s26 }
0x1018   : > { %vm1087_vm12 = vcmp.ge.s32.totalorder %v1962_v43, %v1086_v13 }
0x1019   : > { %v1088_v14 = vsel %vm1087_vm12, 1, %v1837_v4 }
0x101a   : > { %v1089_v15 = vperm.slane %v1088_v14, 0  ;;  %v1090_v16 = vperm.slane %v1088_v14, 1  ;;  %v1091_v17 = vperm.slane %v1088_v14, 2 }
0x101c   : > { %v1092_v18 = vsel %vm362_vm1, %v1089_v15, 0  ;;  %v1093_v19 = vsel %vm362_vm1, %v1090_v16, 0  ;;  %v1094_v21 = vsel %vm362_vm1, %v1091_v17, 0 }
0x101d   : > { %v1095_v20 = vadd.s32 %v1093_v19, %v1092_v18 }
0x101f   : > { %v1096_v22 = vadd.s32 %v1095_v20, %v1094_v21 }
0x1021   : > { %v1098_v24 = vshrl.u32 %v1096_v22, 16  ;;  %v1097_v27 = vand.u32 65535, %v1096_v22 }
0x1023   : > { %v1100_v28 = vcvt.s32.f32 %v1098_v24  ;;  %v1099_v29 = vcvt.s32.f32 %v1097_v27 }
0x1025   : > { %1103 = vadd.xlane.f32.xlu2 %v1100_v28  ;;  %1101 = vadd.xlane.f32.xlu0 %v1099_v29 }
0x1098   : > { %v1104_v30 = vpop.xlane.xlu2 %1103  ;;  %v1102_v31 = vpop.xlane.xlu0 %1101 }
0x1099   : > { %v1106_v32 = vcvt.f32.s32 %v1104_v30  ;;  %v1105_v37 = vcvt.f32.s32 %v1102_v31 }
0x109b   : > { %v1107_v34 = vshll.u32 %v1106_v32, 16 }
0x109d   : > { %v1108_v38 = vadd.s32 %v1107_v34, %v1105_v37 }
0x109f   : > { %v1109_v41 = vrot.slane %v1108_v38, 4 }
0x10a1   : > { %v1110_v1 = vadd.s32 %v1109_v41, %v1108_v38 }
0x10a3   : > { %v1111_v2 = vrot.slane %v1110_v1, 2 }
0x10a5   : > { %v1112_v44 = vadd.s32 %v1111_v2, %v1110_v1 }
0x10a7   : > { %v1113_v45 = vrot.slane %v1112_v44, 1 }
0x10a9   : > { %v1114_v46 = vadd.s32 %v1113_v45, %v1112_v44 }
0x10ab   : > { %1772 = vpush %v1114_v46 }
0x10dc   : > { %s1773_s28 = spop %1772 }
0x10dd   : > { %p1116_p11 = scmp.ge.s32.totalorder %s1773_s28, %s2498_s27 }
0x10df   : > { %s2538_s26 = smov (!%p1116_p11, %s1085_s26), %s2536_s23 }
0x10e0   : > { %s1118_s29 = sor.u32 512, %s2538_s26 }
0x10e1   : > { %v1119_v47 = vstv %s1118_s29 }
0x10e2   : > { %vm1120_vm13 = vcmp.ge.s32.totalorder %v1962_v43, %v1119_v47 }
0x10e3   : > { %v1121_v48 = vsel %vm1120_vm13, 1, %v1837_v4 }
0x10e4   : > { %v1122_v49 = vperm.slane %v1121_v48, 0  ;;  %v1123_v50 = vperm.slane %v1121_v48, 1  ;;  %v1124_v51 = vperm.slane %v1121_v48, 2 }
0x10e6   : > { %v1125_v52 = vsel %vm362_vm1, %v1122_v49, 0  ;;  %v1126_v53 = vsel %vm362_vm1, %v1123_v50, 0  ;;  %v1127_v55 = vsel %vm362_vm1, %v1124_v51, 0 }
0x10e7   : > { %v1128_v54 = vadd.s32 %v1126_v53, %v1125_v52 }
0x10e9   : > { %v1129_v56 = vadd.s32 %v1128_v54, %v1127_v55 }
0x10eb   : > { %v1131_v57 = vshrl.u32 %v1129_v56, 16  ;;  %v1130_v58 = vand.u32 65535, %v1129_v56 }
0x10ed   : > { %v1133_v59 = vcvt.s32.f32 %v1131_v57  ;;  %v1132_v60 = vcvt.s32.f32 %v1130_v58 }
0x10ef   : > { %1136 = vadd.xlane.f32.xlu1 %v1133_v59  ;;  %1134 = vadd.xlane.f32.xlu2 %v1132_v60 }
0x1162   : > { %v1137_v61 = vpop.xlane.xlu1 %1136  ;;  %v1135_v62 = vpop.xlane.xlu2 %1134 }
0x1163   : > { %v1139_v63 = vcvt.f32.s32 %v1137_v61  ;;  %v1138_v10 = vcvt.f32.s32 %v1135_v62 }
0x1165   : > { %v1140_v6 = vshll.u32 %v1139_v63, 16 }
0x1167   : > { %v1141_v11 = vadd.s32 %v1140_v6, %v1138_v10 }
0x1169   : > { %v1142_v12 = vrot.slane %v1141_v11, 4 }
0x116b   : > { %v1143_v13 = vadd.s32 %v1142_v12, %v1141_v11 }
0x116d   : > { %v1144_v14 = vrot.slane %v1143_v13, 2 }
0x116f   : > { %v1145_v15 = vadd.s32 %v1144_v14, %v1143_v13 }
0x1171   : > { %v1146_v16 = vrot.slane %v1145_v15, 1 }
0x1173   : > { %v1147_v17 = vadd.s32 %v1146_v16, %v1145_v15 }
0x1175   : > { %1774 = vpush %v1147_v17 }
0x11a6   : > { %s1775_s30 = spop %1774 }
0x11a7   : > { %p1149_p12 = scmp.ge.s32.totalorder %s1775_s30, %s2498_s27 }
0x11a9   : > { %s2540_s29 = smov (!%p1149_p12, %s1118_s29), %s2538_s26  ;;  %s1726_s26 = smul.u32 12, %s2496_s16 }
0x11aa   : > { %s1151_s5 = sor.u32 256, %s2540_s29 }
0x11ab   : > { %v1152_v18 = vstv %s1151_s5  ;;  %s239_s30 = scalar_lea.vmem %s2483_s1, %s1726_s26 }
0x11ac   : > { %vm1153_vm14 = vcmp.ge.s32.totalorder %v1962_v43, %v1152_v18 }
0x11ad   : > { %v1154_v19 = vsel %vm1153_vm14, 1, %v1837_v4 }
0x11ae   : > { %v1155_v20 = vperm.slane %v1154_v19, 0  ;;  %v1156_v21 = vperm.slane %v1154_v19, 1  ;;  %v1157_v22 = vperm.slane %v1154_v19, 2 }
0x11b0   : > { %v1158_v24 = vsel %vm362_vm1, %v1155_v20, 0  ;;  %v1159_v27 = vsel %vm362_vm1, %v1156_v21, 0  ;;  %v1160_v29 = vsel %vm362_vm1, %v1157_v22, 0 }
0x11b1   : > { %v1161_v28 = vadd.s32 %v1159_v27, %v1158_v24 }
0x11b3   : > { %v1162_v30 = vadd.s32 %v1161_v28, %v1160_v29 }
0x11b5   : > { %v1164_v31 = vshrl.u32 %v1162_v30, 16  ;;  %v1163_v32 = vand.u32 65535, %v1162_v30 }
0x11b7   : > { %v1166_v34 = vcvt.s32.f32 %v1164_v31  ;;  %v1165_v37 = vcvt.s32.f32 %v1163_v32 }
0x11b9   : > { %1169 = vadd.xlane.f32.xlu0 %v1166_v34  ;;  %1167 = vadd.xlane.f32.xlu1 %v1165_v37 }
0x122c   : > { %v1170_v38 = vpop.xlane.xlu0 %1169  ;;  %v1168_v41 = vpop.xlane.xlu1 %1167 }
0x122d   : > { %v1172_v1 = vcvt.f32.s32 %v1170_v38  ;;  %v1171_v44 = vcvt.f32.s32 %v1168_v41 }
0x122f   : > { %v1173_v2 = vshll.u32 %v1172_v1, 16 }
0x1231   : > { %v1174_v45 = vadd.s32 %v1173_v2, %v1171_v44 }
0x1233   : > { %v1175_v46 = vrot.slane %v1174_v45, 4 }
0x1235   : > { %v1176_v47 = vadd.s32 %v1175_v46, %v1174_v45 }
0x1237   : > { %v1177_v48 = vrot.slane %v1176_v47, 2 }
0x1239   : > { %v1178_v49 = vadd.s32 %v1177_v48, %v1176_v47 }
0x123b   : > { %v1179_v50 = vrot.slane %v1178_v49, 1 }
0x123d   : > { %v1180_v51 = vadd.s32 %v1179_v50, %v1178_v49 }
0x123f   : > { %1776 = vpush %v1180_v51 }
0x1270   : > { %s1777_s6 = spop %1776 }
0x1271   : > { %p1182_p13 = scmp.ge.s32.totalorder %s1777_s6, %s2498_s27 }
0x1273   : > { %s2542_s5 = smov (!%p1182_p13, %s1151_s5), %s2540_s29 }
0x1274   : > { %s1184_s7 = sor.u32 128, %s2542_s5 }
0x1275   : > { %v1185_v52 = vstv %s1184_s7 }
0x1276   : > { %vm1186_vm15 = vcmp.ge.s32.totalorder %v1962_v43, %v1185_v52 }
0x1277   : > { %v1187_v53 = vsel %vm1186_vm15, 1, %v1837_v4  ;;  %vm2418_vm15 = vcmp.eq.s32.totalorder %v359_v7, 1 }
0x1278   : > { %v1188_v54 = vperm.slane %v1187_v53, 0  ;;  %v1189_v55 = vperm.slane %v1187_v53, 1  ;;  %v1190_v56 = vperm.slane %v1187_v53, 2 }
0x127a   : > { %v1191_v57 = vsel %vm362_vm1, %v1188_v54, 0  ;;  %v1192_v58 = vsel %vm362_vm1, %v1189_v55, 0  ;;  %v1193_v60 = vsel %vm362_vm1, %v1190_v56, 0 }
0x127b   : > { %v1194_v59 = vadd.s32 %v1192_v58, %v1191_v57 }
0x127d   : > { %v1195_v61 = vadd.s32 %v1194_v59, %v1193_v60 }
0x127f   : > { %v1197_v62 = vshrl.u32 %v1195_v61, 16  ;;  %v1196_v63 = vand.u32 65535, %v1195_v61 }
0x1281   : > { %v1199_v6 = vcvt.s32.f32 %v1197_v62  ;;  %v1198_v10 = vcvt.s32.f32 %v1196_v63 }
0x1283   : > { %1202 = vadd.xlane.f32.xlu2 %v1199_v6  ;;  %1200 = vadd.xlane.f32.xlu0 %v1198_v10 }
0x12f6   : > { %v1203_v11 = vpop.xlane.xlu2 %1202  ;;  %v1201_v12 = vpop.xlane.xlu0 %1200 }
0x12f7   : > { %v1205_v13 = vcvt.f32.s32 %v1203_v11  ;;  %v1204_v15 = vcvt.f32.s32 %v1201_v12 }
0x12f9   : > { %v1206_v14 = vshll.u32 %v1205_v13, 16 }
0x12fb   : > { %v1207_v16 = vadd.s32 %v1206_v14, %v1204_v15 }
0x12fd   : > { %v1208_v17 = vrot.slane %v1207_v16, 4 }
0x12ff   : > { %v1209_v18 = vadd.s32 %v1208_v17, %v1207_v16 }
0x1301   : > { %v1210_v19 = vrot.slane %v1209_v18, 2 }
0x1303   : > { %v1211_v20 = vadd.s32 %v1210_v19, %v1209_v18 }
0x1305   : > { %v1212_v21 = vrot.slane %v1211_v20, 1 }
0x1307   : > { %v1213_v22 = vadd.s32 %v1212_v21, %v1211_v20 }
0x1309   : > { %1778 = vpush %v1213_v22 }
0x133a   : > { %s1779_s8 = spop %1778 }
0x133b   : > { %p1215_p0 = scmp.ge.s32.totalorder %s1779_s8, %s2498_s27 }
0x133d   : > { %s2544_s7 = smov (!%p1215_p0, %s1184_s7), %s2542_s5 }
0x133e   : > { %s1217_s9 = sor.u32 64, %s2544_s7 }
0x133f   : > { %v1218_v24 = vstv %s1217_s9 }
0x1340   : > { %vm1219_vm2 = vcmp.ge.s32.totalorder %v1962_v43, %v1218_v24 }
0x1341   : > { %v1220_v27 = vsel %vm1219_vm2, 1, %v1837_v4  ;;  %vm2424_vm2 = vcmp.eq.s32.totalorder %v360_v8, 1 }
0x1342   : > { %v1221_v28 = vperm.slane %v1220_v27, 0  ;;  %v1222_v29 = vperm.slane %v1220_v27, 1  ;;  %v1223_v30 = vperm.slane %v1220_v27, 2 }
0x1344   : > { %v1224_v31 = vsel %vm362_vm1, %v1221_v28, 0  ;;  %v1225_v32 = vsel %vm362_vm1, %v1222_v29, 0  ;;  %v1226_v37 = vsel %vm362_vm1, %v1223_v30, 0 }
0x1345   : > { %v1227_v34 = vadd.s32 %v1225_v32, %v1224_v31 }
0x1347   : > { %v1228_v38 = vadd.s32 %v1227_v34, %v1226_v37 }
0x1349   : > { %v1230_v41 = vshrl.u32 %v1228_v38, 16  ;;  %v1229_v1 = vand.u32 65535, %v1228_v38 }
0x134b   : > { %v1232_v2 = vcvt.s32.f32 %v1230_v41  ;;  %v1231_v44 = vcvt.s32.f32 %v1229_v1 }
0x134d   : > { %1235 = vadd.xlane.f32.xlu1 %v1232_v2  ;;  %1233 = vadd.xlane.f32.xlu2 %v1231_v44 }
0x13c0   : > { %v1236_v45 = vpop.xlane.xlu1 %1235  ;;  %v1234_v46 = vpop.xlane.xlu2 %1233 }
0x13c1   : > { %v1238_v47 = vcvt.f32.s32 %v1236_v45  ;;  %v1237_v49 = vcvt.f32.s32 %v1234_v46 }
0x13c3   : > { %v1239_v48 = vshll.u32 %v1238_v47, 16 }
0x13c5   : > { %v1240_v50 = vadd.s32 %v1239_v48, %v1237_v49 }
0x13c7   : > { %v1241_v51 = vrot.slane %v1240_v50, 4 }
0x13c9   : > { %v1242_v52 = vadd.s32 %v1241_v51, %v1240_v50 }
0x13cb   : > { %v1243_v53 = vrot.slane %v1242_v52, 2 }
0x13cd   : > { %v1244_v54 = vadd.s32 %v1243_v53, %v1242_v52 }
0x13cf   : > { %v1245_v55 = vrot.slane %v1244_v54, 1 }
0x13d1   : > { %v1246_v56 = vadd.s32 %v1245_v55, %v1244_v54 }
0x13d3   : > { %1780 = vpush %v1246_v56 }
0x1404   : > { %s1781_s10 = spop %1780 }
0x1405   : > { %p1248_p1 = scmp.ge.s32.totalorder %s1781_s10, %s2498_s27 }
0x1407   : > { %s2546_s9 = smov (!%p1248_p1, %s1217_s9), %s2544_s7  ;;  %s244_s7 = scalar_lea.vmem %s2484_s2, %s1726_s26 }
0x1408   : > { %s1250_s11 = sor.u32 32, %s2546_s9 }
0x1409   : > { %v1251_v57 = vstv %s1250_s11 }
0x140a   : > { %vm1252_vm4 = vcmp.ge.s32.totalorder %v1962_v43, %v1251_v57 }
0x140b   : > { %v1253_v58 = vsel %vm1252_vm4, 1, %v1837_v4 }
0x140c   : > { %v1254_v59 = vperm.slane %v1253_v58, 0  ;;  %v1255_v60 = vperm.slane %v1253_v58, 1  ;;  %v1256_v61 = vperm.slane %v1253_v58, 2 }
0x140e   : > { %v1257_v62 = vsel %vm362_vm1, %v1254_v59, 0  ;;  %v1258_v63 = vsel %vm362_vm1, %v1255_v60, 0  ;;  %v1259_v10 = vsel %vm362_vm1, %v1256_v61, 0 }
0x140f   : > { %v1260_v6 = vadd.s32 %v1258_v63, %v1257_v62 }
0x1411   : > { %v1261_v11 = vadd.s32 %v1260_v6, %v1259_v10 }
0x1413   : > { %v1263_v12 = vshrl.u32 %v1261_v11, 16  ;;  %v1262_v13 = vand.u32 65535, %v1261_v11 }
0x1415   : > { %v1265_v14 = vcvt.s32.f32 %v1263_v12  ;;  %v1264_v15 = vcvt.s32.f32 %v1262_v13 }
0x1417   : > { %1268 = vadd.xlane.f32.xlu0 %v1265_v14  ;;  %1266 = vadd.xlane.f32.xlu1 %v1264_v15 }
0x148a   : > { %v1269_v16 = vpop.xlane.xlu0 %1268  ;;  %v1267_v17 = vpop.xlane.xlu1 %1266 }
0x148b   : > { %v1271_v18 = vcvt.f32.s32 %v1269_v16  ;;  %v1270_v20 = vcvt.f32.s32 %v1267_v17 }
0x148d   : > { %v1272_v19 = vshll.u32 %v1271_v18, 16 }
0x148f   : > { %v1273_v21 = vadd.s32 %v1272_v19, %v1270_v20 }
0x1491   : > { %v1274_v22 = vrot.slane %v1273_v21, 4 }
0x1493   : > { %v1275_v24 = vadd.s32 %v1274_v22, %v1273_v21 }
0x1495   : > { %v1276_v27 = vrot.slane %v1275_v24, 2 }
0x1497   : > { %v1277_v28 = vadd.s32 %v1276_v27, %v1275_v24 }
0x1499   : > { %v1278_v29 = vrot.slane %v1277_v28, 1 }
0x149b   : > { %v1279_v30 = vadd.s32 %v1278_v29, %v1277_v28 }
0x149d   : > { %1782 = vpush %v1279_v30 }
0x14ce   : > { %s1783_s12 = spop %1782 }
0x14cf   : > { %p1281_p2 = scmp.ge.s32.totalorder %s1783_s12, %s2498_s27 }
0x14d1   : > { %s2548_s11 = smov (!%p1281_p2, %s1250_s11), %s2546_s9 }
0x14d2   : > { %s1283_s13 = sor.u32 16, %s2548_s11 }
0x14d3   : > { %v1284_v31 = vstv %s1283_s13 }
0x14d4   : > { %vm1285_vm5 = vcmp.ge.s32.totalorder %v1962_v43, %v1284_v31 }
0x14d5   : > { %v1286_v32 = vsel %vm1285_vm5, 1, %v1837_v4  ;;  %vm1595_vm5 = vcmask 1043456  }
0x14d6   : > { %v1287_v34 = vperm.slane %v1286_v32, 0  ;;  %v1288_v37 = vperm.slane %v1286_v32, 1  ;;  %v1289_v38 = vperm.slane %v1286_v32, 2 }
0x14d8   : > { %v1290_v41 = vsel %vm362_vm1, %v1287_v34, 0  ;;  %v1291_v1 = vsel %vm362_vm1, %v1288_v37, 0  ;;  %v1292_v44 = vsel %vm362_vm1, %v1289_v38, 0 }
0x14d9   : > { %v1293_v2 = vadd.s32 %v1291_v1, %v1290_v41 }
0x14db   : > { %v1294_v45 = vadd.s32 %v1293_v2, %v1292_v44 }
0x14dd   : > { %v1296_v46 = vshrl.u32 %v1294_v45, 16  ;;  %v1295_v47 = vand.u32 65535, %v1294_v45 }
0x14df   : > { %v1298_v48 = vcvt.s32.f32 %v1296_v46  ;;  %v1297_v49 = vcvt.s32.f32 %v1295_v47 }
0x14e1   : > { %1301 = vadd.xlane.f32.xlu2 %v1298_v48  ;;  %1299 = vadd.xlane.f32.xlu0 %v1297_v49 }
0x1554   : > { %v1302_v50 = vpop.xlane.xlu2 %1301  ;;  %v1300_v51 = vpop.xlane.xlu0 %1299 }
0x1555   : > { %v1304_v52 = vcvt.f32.s32 %v1302_v50  ;;  %v1303_v54 = vcvt.f32.s32 %v1300_v51 }
0x1557   : > { %v1305_v53 = vshll.u32 %v1304_v52, 16 }
0x1559   : > { %v1306_v55 = vadd.s32 %v1305_v53, %v1303_v54 }
0x155b   : > { %v1307_v56 = vrot.slane %v1306_v55, 4 }
0x155d   : > { %v1308_v57 = vadd.s32 %v1307_v56, %v1306_v55 }
0x155f   : > { %v1309_v58 = vrot.slane %v1308_v57, 2 }
0x1561   : > { %v1310_v59 = vadd.s32 %v1309_v58, %v1308_v57 }
0x1563   : > { %v1311_v60 = vrot.slane %v1310_v59, 1 }
0x1565   : > { %v1312_v61 = vadd.s32 %v1311_v60, %v1310_v59 }
0x1567   : > { %1784 = vpush %v1312_v61 }
0x1598   : > { %s1785_s14 = spop %1784 }
0x1599   : > { %p1314_p3 = scmp.ge.s32.totalorder %s1785_s14, %s2498_s27 }
0x159b   : > { %s2550_s13 = smov (!%p1314_p3, %s1283_s13), %s2548_s11 }
0x159c   : > { %s1316_s17 = sor.u32 8, %s2550_s13 }
0x159d   : > { %v1317_v62 = vstv %s1316_s17 }
0x159e   : > { %vm1318_vm6 = vcmp.ge.s32.totalorder %v1962_v43, %v1317_v62 }
0x159f   : > { %v1319_v63 = vsel %vm1318_vm6, 1, %v1837_v4 }
0x15a0   : > { %v1320_v6 = vperm.slane %v1319_v63, 0  ;;  %v1321_v10 = vperm.slane %v1319_v63, 1  ;;  %v1322_v11 = vperm.slane %v1319_v63, 2 }
0x15a2   : > { %v1323_v12 = vsel %vm362_vm1, %v1320_v6, 0  ;;  %v1324_v13 = vsel %vm362_vm1, %v1321_v10, 0  ;;  %v1325_v15 = vsel %vm362_vm1, %v1322_v11, 0 }
0x15a3   : > { %v1326_v14 = vadd.s32 %v1324_v13, %v1323_v12 }
0x15a5   : > { %v1327_v16 = vadd.s32 %v1326_v14, %v1325_v15 }
0x15a7   : > { %v1329_v17 = vshrl.u32 %v1327_v16, 16  ;;  %v1328_v18 = vand.u32 65535, %v1327_v16 }
0x15a9   : > { %v1331_v19 = vcvt.s32.f32 %v1329_v17  ;;  %v1330_v20 = vcvt.s32.f32 %v1328_v18 }
0x15ab   : > { %1334 = vadd.xlane.f32.xlu1 %v1331_v19  ;;  %1332 = vadd.xlane.f32.xlu2 %v1330_v20 }
0x161e   : > { %v1335_v21 = vpop.xlane.xlu1 %1334  ;;  %v1333_v22 = vpop.xlane.xlu2 %1332 }
0x161f   : > { %v1337_v24 = vcvt.f32.s32 %v1335_v21  ;;  %v1336_v28 = vcvt.f32.s32 %v1333_v22 }
0x1621   : > { %v1338_v27 = vshll.u32 %v1337_v24, 16 }
0x1623   : > { %v1339_v29 = vadd.s32 %v1338_v27, %v1336_v28 }
0x1625   : > { %v1340_v30 = vrot.slane %v1339_v29, 4 }
0x1627   : > { %v1341_v31 = vadd.s32 %v1340_v30, %v1339_v29 }
0x1629   : > { %v1342_v32 = vrot.slane %v1341_v31, 2 }
0x162b   : > { %v1343_v34 = vadd.s32 %v1342_v32, %v1341_v31 }
0x162d   : > { %v1344_v37 = vrot.slane %v1343_v34, 1 }
0x162f   : > { %v1345_v38 = vadd.s32 %v1344_v37, %v1343_v34 }
0x1631   : > { %1786 = vpush %v1345_v38 }
0x1662   : > { %s1787_s18 = spop %1786 }
0x1663   : > { %p1347_p4 = scmp.ge.s32.totalorder %s1787_s18, %s2498_s27  ;;  %s1720_s18 = sshll.u32 %s2496_s16, 3 }
0x1665   : > { %s2552_s17 = smov (!%p1347_p4, %s1316_s17), %s2550_s13 }
0x1666   : > { %s1349_s19 = sor.u32 4, %s2552_s17 }
0x1667   : > { %v1350_v41 = vstv %s1349_s19 }
0x1668   : > { %vm1351_vm7 = vcmp.ge.s32.totalorder %v1962_v43, %v1350_v41 }
0x1669   : > { %v1352_v1 = vsel %vm1351_vm7, 1, %v1837_v4  ;;  %vm2444_vm7 = vcmp.eq.s32.totalorder %v361_v9, 1 }
0x166a   : > { %v1353_v2 = vperm.slane %v1352_v1, 0  ;;  %v1354_v44 = vperm.slane %v1352_v1, 1  ;;  %v1355_v45 = vperm.slane %v1352_v1, 2 }
0x166c   : > { %v1356_v46 = vsel %vm362_vm1, %v1353_v2, 0  ;;  %v1357_v47 = vsel %vm362_vm1, %v1354_v44, 0  ;;  %v1358_v49 = vsel %vm362_vm1, %v1355_v45, 0 }
0x166d   : > { %v1359_v48 = vadd.s32 %v1357_v47, %v1356_v46 }
0x166f   : > { %v1360_v50 = vadd.s32 %v1359_v48, %v1358_v49 }
0x1671   : > { %v1362_v51 = vshrl.u32 %v1360_v50, 16  ;;  %v1361_v52 = vand.u32 65535, %v1360_v50 }
0x1673   : > { %v1364_v53 = vcvt.s32.f32 %v1362_v51  ;;  %v1363_v54 = vcvt.s32.f32 %v1361_v52 }
0x1675   : > { %1367 = vadd.xlane.f32.xlu0 %v1364_v53  ;;  %1365 = vadd.xlane.f32.xlu1 %v1363_v54 }
0x16e8   : > { %v1368_v55 = vpop.xlane.xlu0 %1367  ;;  %v1366_v56 = vpop.xlane.xlu1 %1365 }
0x16e9   : > { %v1370_v57 = vcvt.f32.s32 %v1368_v55  ;;  %v1369_v59 = vcvt.f32.s32 %v1366_v56 }
0x16eb   : > { %v1371_v58 = vshll.u32 %v1370_v57, 16 }
0x16ed   : > { %v1372_v60 = vadd.s32 %v1371_v58, %v1369_v59 }
0x16ef   : > { %v1373_v61 = vrot.slane %v1372_v60, 4 }
0x16f1   : > { %v1374_v62 = vadd.s32 %v1373_v61, %v1372_v60 }
0x16f3   : > { %v1375_v63 = vrot.slane %v1374_v62, 2 }
0x16f5   : > { %v1376_v6 = vadd.s32 %v1375_v63, %v1374_v62 }
0x16f7   : > { %v1377_v10 = vrot.slane %v1376_v6, 1 }
0x16f9   : > { %v1378_v11 = vadd.s32 %v1377_v10, %v1376_v6 }
0x16fb   : > { %1788 = vpush %v1378_v11 }
0x172c   : > { %s1789_s20 = spop %1788 }
0x172d   : > { %p1380_p5 = scmp.ge.s32.totalorder %s1789_s20, %s2498_s27 }
0x172f   : > { %s2554_s19 = smov (!%p1380_p5, %s1349_s19), %s2552_s17 }
0x1730   : > { %s1382_s22 = sor.u32 2, %s2554_s19 }
0x1731   : > { %v1383_v12 = vstv %s1382_s22 }
0x1732   : > { %vm1384_vm8 = vcmp.ge.s32.totalorder %v1962_v43, %v1383_v12 }
0x1733   : > { %v1385_v13 = vsel %vm1384_vm8, 1, %v1837_v4 }
0x1734   : > { %v1386_v14 = vperm.slane %v1385_v13, 0  ;;  %v1387_v15 = vperm.slane %v1385_v13, 1  ;;  %v1388_v16 = vperm.slane %v1385_v13, 2 }
0x1736   : > { %v1389_v17 = vsel %vm362_vm1, %v1386_v14, 0  ;;  %v1390_v18 = vsel %vm362_vm1, %v1387_v15, 0  ;;  %v1391_v20 = vsel %vm362_vm1, %v1388_v16, 0 }
0x1737   : > { %v1392_v19 = vadd.s32 %v1390_v18, %v1389_v17  ;;  %v322_v17 = vshrl.u32 %v321_v35, 7  ;;  %v1825_v18 = vld [vmem:[%s1878_s21] sm:$0x7]  ;;  %v1827_v35 = vld [vmem:[%s1886_s24 + $0x10] sm:$0xff] }
0x1739   : > { %v1393_v21 = vadd.s32 %v1392_v19, %v1391_v20  ;;  %v324_v19 = vperm.slane %v1825_v18, 1  ;;  %v325_v20 = vperm.slane %v1825_v18, 2 }
0x173b   : > { %v1395_v22 = vshrl.u32 %v1393_v21, 16  ;;  %v1394_v24 = vand.u32 65535, %v1393_v21  ;;  %v323_v21 = vperm.slane %v1825_v18, 0  ;;  %vm327_vm10 = vcmp.eq.s32.totalorder %v322_v17, %v324_v19 }
0x173c   : > { %vm328_vm11 = vcmp.eq.s32.totalorder %v322_v17, %v325_v20 }
0x173d   : > { %v1397_v27 = vcvt.s32.f32 %v1395_v22  ;;  %v1396_v28 = vcvt.s32.f32 %v1394_v24  ;;  %v1826_v22 = vld [vmem:[%s1886_s24 + $0x8] sm:$0xff]  ;;  %vm326_vm12 = vcmp.eq.s32.totalorder %v322_v17, %v323_v21 }
0x173e   : > { %v330_v24 = vsel %vm327_vm10, %v1826_v22, 0.0 }
0x173f   : > { %1400 = vadd.xlane.f32.xlu2 %v1397_v27  ;;  %1398 = vadd.xlane.f32.xlu0 %v1396_v28  ;;  %v331_v27 = vsel %vm328_vm11, %v1827_v35, 0.0  ;;  %v338_v28 = vrot.slane %v330_v24, 4 }
0x17b2   : > { %v1401_v29 = vpop.xlane.xlu2 %1400  ;;  %v1399_v30 = vpop.xlane.xlu0 %1398 }
0x17b3   : > { %v1403_v31 = vcvt.f32.s32 %v1401_v29  ;;  %v1402_v34 = vcvt.f32.s32 %v1399_v30  ;;  %v1828_v29 = vld [vmem:[%s1886_s24] sm:$0xff] }
0x17b4   : > { %v329_v30 = vsel %vm326_vm12, %v1828_v29, 0.0 }
0x17b5   : > { %v1404_v32 = vshll.u32 %v1403_v31, 16  ;;  %v256_v31 = vld [vmem:[%s239_s30] sm:$0xff] }
0x17b7   : > { %v1405_v37 = vadd.s32 %v1404_v32, %v1402_v34  ;;  %v258_v32 = vld [vmem:[%s244_s7] sm:$0xff]  ;;  %v344_v34 = vrot.slane %v331_v27, 4 }
0x17b9   : > { %v1406_v38 = vrot.slane %v1405_v37, 4 }
0x17bb   : > { %v1407_v41 = vadd.s32 %v1406_v38, %v1405_v37  ;;  %v257_v37 = vld [vmem:[%s239_s30 + $0x8] sm:$0xf] }
0x17bc   : > { %v259_v38 = vld [vmem:[%s244_s7 + $0x8] sm:$0xf] }
0x17bd   : > { %v1408_v1 = vrot.slane %v1407_v41, 2 }
0x17bf   : > { %v1409_v2 = vadd.s32 %v1408_v1, %v1407_v41  ;;  %v332_v41 = vrot.slane %v329_v30, 4  ;;  %v339_v1 = vadd.f32 %v338_v28, %v330_v24 }
0x17c1   : > { %v1410_v44 = vrot.slane %v1409_v2, 1 }
0x17c3   : > { %v1411_v45 = vadd.s32 %v1410_v44, %v1409_v2  ;;  %v1564_v2 = vsub.f32 %v256_v31, %v258_v32  ;;  %v1565_v44 = vsub.f32 %v257_v37, %v259_v38 }
0x17c5   : > { %1790 = vpush %v1411_v45  ;;  %v345_v45 = vadd.f32 %v344_v34, %v331_v27 }
0x17f6   : > { %s1791_s23 = spop %1790 }
0x17f7   : > { %p1413_p6 = scmp.ge.s32.totalorder %s1791_s23, %s2498_s27  ;;  %s252_s23 = scalar_lea.vmem %s2486_s4, %s1720_s18 }
0x17f9   : > { %s2556_s22 = smov (!%p1413_p6, %s1382_s22), %s2554_s19 }
0x17fa   : > { %s1415_s25 = sor.u32 1, %s2556_s22 }
0x17fb   : > { %v1416_v46 = vstv %s1415_s25 }
0x17fc   : > { %vm1417_vm9 = vcmp.ge.s32.totalorder %v1962_v43, %v1416_v46  ;;  %v333_v46 = vadd.f32 %v332_v41, %v329_v30 }
0x17fd   : > { %v1418_v47 = vsel %vm1417_vm9, 1, %v1837_v4 }
0x17fe   : > { %v1419_v48 = vperm.slane %v1418_v47, 0  ;;  %v1420_v49 = vperm.slane %v1418_v47, 1  ;;  %v1421_v50 = vperm.slane %v1418_v47, 2  ;;  %v340_v47 = vrot.slane %v339_v1, 2 }
0x1800   : > { %v1422_v51 = vsel %vm362_vm1, %v1419_v48, 0  ;;  %v1423_v52 = vsel %vm362_vm1, %v1420_v49, 0  ;;  %v1424_v54 = vsel %vm362_vm1, %v1421_v50, 0  ;;  %v1566_v48 = vand.u32 2147483647, %v1564_v2 }
0x1801   : > { %v1425_v53 = vadd.s32 %v1423_v52, %v1422_v51  ;;  %v1570_v49 = vmul.f32 0.5, %v1564_v2  ;;  %v1571_v50 = vmul.f32 0.5, %v1565_v44  ;;  %v346_v51 = vrot.slane %v345_v45, 2 }
0x1802   : > { %v334_v52 = vrot.slane %v333_v46, 2  ;;  %vm1568_vm13 = vcmp.lt.f32.partialorder %v1566_v48, 1.0 }
0x1803   : > { %v1426_v55 = vadd.s32 %v1425_v53, %v1424_v54  ;;  %v341_v53 = vadd.f32 %v340_v47, %v339_v1  ;;  %v1567_v54 = vand.u32 2147483647, %v1565_v44 }
0x1805   : > { %v1428_v56 = vshrl.u32 %v1426_v55, 16  ;;  %v1427_v57 = vand.u32 65535, %v1426_v55  ;;  %v1572_v55 = vmul.f32 %v1570_v49, %v1564_v2  ;;  %vm1569_vm14 = vcmp.lt.f32.partialorder %v1567_v54, 1.0 }
0x1807   : > { %v1430_v58 = vcvt.s32.f32 %v1428_v56  ;;  %v1429_v59 = vcvt.s32.f32 %v1427_v57  ;;  %v1721_v56 = vadd.f32 -0.5, %v1566_v48  ;;  %v1573_v57 = vmul.f32 %v1571_v50, %v1565_v44 }
0x1809   : > { %1433 = vadd.xlane.f32.xlu1 %v1430_v58  ;;  %1431 = vadd.xlane.f32.xlu2 %v1429_v59  ;;  %v347_v58 = vadd.f32 %v346_v51, %v345_v45  ;;  %v335_v59 = vadd.f32 %v334_v52, %v333_v46 }
0x187c   : > { %v1434_v60 = vpop.xlane.xlu1 %1433  ;;  %v1432_v61 = vpop.xlane.xlu2 %1431 }
0x187d   : > { %v1436_v62 = vcvt.f32.s32 %v1434_v60  ;;  %v1435_v6 = vcvt.f32.s32 %v1432_v61  ;;  %v342_v60 = vrot.slane %v341_v53, 1  ;;  %v1722_v61 = vadd.f32 -0.5, %v1567_v54 }
0x187f   : > { %v1437_v63 = vshll.u32 %v1436_v62, 16  ;;  %v1576_v62 = vsel %vm1568_vm13, %v1572_v55, %v1721_v56 }
0x1880   : > { %1583 = vst [vmem:[#allocation1] ss:$2 sm:$0xff] %v1576_v62 }
0x1881   : > { %v1438_v10 = vadd.s32 %v1437_v63, %v1435_v6  ;;  %v1577_v63 = vsel %vm1569_vm14, %v1573_v57, %v1722_v61  ;;  %v348_v6 = vrot.slane %v347_v58, 1 }
0x1882   : > { %1585 = vst [vmem:[#allocation1 + $0x10] ss:$2 sm:$0xff] %v1577_v63 }
0x1883   : > { %v1439_v11 = vrot.slane %v1438_v10, 4 }
0x1885   : > { %v1440_v12 = vadd.s32 %v1439_v11, %v1438_v10  ;;  %v336_v10 = vrot.slane %v335_v59, 1  ;;  %v343_v11 = vadd.f32 %v342_v60, %v341_v53 }
0x1887   : > { %v1441_v13 = vrot.slane %v1440_v12, 2 }
0x1889   : > { %v1442_v14 = vadd.s32 %v1441_v13, %v1440_v12  ;;  %v349_v12 = vadd.f32 %v348_v6, %v347_v58  ;;  %v337_v13 = vadd.f32 %v336_v10, %v335_v59  ;;  %v1588_v1 = vld.sshfl [vmem:[#allocation1 + $0x10] sm:$0xff pattern:$0x75316420] }
0x188a   : > { %v1594_v50 = vsel %vm2444_vm7, %v1588_v1, 0.0 }
0x188b   : > { %v1443_v15 = vrot.slane %v1442_v14, 1  ;;  %v1599_v61 = vsel %vm1595_vm5, %v1594_v50, 0.0 }
0x188d   : > { %v1444_v16 = vadd.s32 %v1443_v15, %v1442_v14  ;;  %v351_v14 = vsub.f32 %v343_v11, %v1927_v36  ;;  %v352_v15 = vsub.f32 %v349_v12, %v1931_v39 }
0x188f   : > { %1792 = vpush %v1444_v16  ;;  %v350_v16 = vsub.f32 %v337_v13, %v1925_v33  ;;  %v354_v17 = vsub.f32 %v351_v14, %v1942_v25  ;;  %v355_v18 = vsub.f32 %v352_v15, %v1944_v26  ;;  %v1586_v33 = vld.sshfl [vmem:[#allocation1] sm:$0xff pattern:$0x75316420]  ;;  %v1587_v25 = vld.sshfl [vmem:[#allocation1 + $0x8] sm:$0xff pattern:$0x75316420] }
0x1890   : > { %v1592_v7 = vsel %vm2418_vm15, %v1586_v33, 0.0  ;;  %v1593_v8 = vsel %vm2424_vm2, %v1587_v25, 0.0 }
0x1891   : > { %v353_v19 = vsub.f32 %v350_v16, %v1940_v23  ;;  %v1531_v20 = vsub.f32 0.0, %v354_v17  ;;  %v1532_v21 = vsub.f32 0.0, %v355_v18  ;;  %v1596_v48 = vsel %vm1595_vm5, %v1592_v7, 0.0 }
0x1892   : > { %v1597_v5 = vsel %vm1595_vm5, %v1593_v8, 0.0 }
0x1893   : > { %v1530_v22 = vsub.f32 0.0, %v353_v19  ;;  %v1536_v24 = vrot.slane %v1531_v20, 7  ;;  %v1537_v39 = vrot.slane %v1532_v21, 6  ;;  %v1598_v56 = vadd.f32 %v1597_v5, %v1596_v48 }
0x1895   : > { %v1538_v26 = vsel %vm362_vm1, %v1530_v22, %v1536_v24  ;;  %v1600_v11 = vadd.f32 %v1599_v61, %v1598_v56 }
0x1896   : > { %v1539_v29 = vsel %vm424_vm3, %v1538_v26, %v1537_v39 }
0x18c0   : > { %s1793_s21 = spop %1792 }
0x18c1   : > { %p1446_p7 = scmp.ge.s32.totalorder %s1793_s21, %s2498_s27 }
0x18c3   : > { %s2558_s25 = smov (!%p1446_p7, %s1415_s25), %s2556_s22 }
0x18c4   : > { %v1448_v35 = vstv %s2558_s25 }
0x18c5   : > { %vm1449_vm4 = vcmp.gt.s32.totalorder %v1962_v43, %v1448_v35  ;;  %vm2438_vm6 = vcmp.eq.s32.totalorder %v1962_v43, %v1448_v35  ;;  %v1541_v43 = vsel %vm356_vm0, %v1539_v29, 0.0  ;;  %vm1613_vm0 = vcmp.eq.s32.totalorder %v1970_v40, 1 }
0x18c6   : > { %v1450_v27 = vsel %vm1449_vm4, 1, %v1837_v4  ;;  %v1479_v28 = vsel %vm1449_vm4, %v1957_v42, 0.0  ;;  %v1502_v51 = vsel %vm2438_vm6, %v1957_v42, 0.0  ;;  %v1543_v53 = vperm.slane %v1541_v43, 0 }
0x18c7   : > { %v1481_v30 = vperm.slane %v1479_v28, 0  ;;  %v1482_v31 = vperm.slane %v1479_v28, 1  ;;  %v1483_v32 = vperm.slane %v1479_v28, 2  ;;  %v1451_v34 = vperm.slane %v1450_v27, 0 }
0x18c8   : > { %v1452_v38 = vperm.slane %v1450_v27, 1  ;;  %v1453_v41 = vperm.slane %v1450_v27, 2  ;;  %v1544_v54 = vperm.slane %v1541_v43, 1  ;;  %v1504_v57 = vperm.slane %v1502_v51, 0 }
0x18c9   : > { %v1487_v2 = vsel %vm362_vm1, %v1481_v30, 0.0  ;;  %v1488_v44 = vsel %vm362_vm1, %v1482_v31, 0.0  ;;  %v1454_v45 = vsel %vm362_vm1, %v1451_v34, 0  ;;  %v1490_v9 = vsel %vm362_vm1, %v1483_v32, 0.0 }
0x18ca   : > { %v1489_v46 = vadd.f32 %v1488_v44, %v1487_v2  ;;  %v1455_v47 = vsel %vm362_vm1, %v1452_v38, 0  ;;  %v1456_v0 = vsel %vm362_vm1, %v1453_v41, 0  ;;  %v1505_v58 = vperm.slane %v1502_v51, 1 }
0x18cb   : > { %v1457_v49 = vadd.s32 %v1455_v47, %v1454_v45  ;;  %v1545_v62 = vperm.slane %v1541_v43, 2  ;;  %v1549_v63 = vsel %vm362_vm1, %v1543_v53, 0.0  ;;  %v1550_v6 = vsel %vm362_vm1, %v1544_v54, 0.0 }
0x18cc   : > { %v1491_v52 = vadd.f32 %v1490_v9, %v1489_v46  ;;  %v1510_v12 = vsel %vm362_vm1, %v1504_v57, -inf  ;;  %v1511_v13 = vsel %vm362_vm1, %v1505_v58, -inf  ;;  %v1551_v14 = vadd.f32 %v1550_v6, %v1549_v63 }
0x18cd   : > { %v1458_v55 = vadd.s32 %v1457_v49, %v1456_v0  ;;  %v1506_v15 = vperm.slane %v1502_v51, 2  ;;  %v1552_v16 = vsel %vm362_vm1, %v1545_v62, 0.0  ;;  %v1513_v17 = vmax.f32 %v1510_v12, %v1511_v13 }
0x18ce   : > { %1492 = vadd.xlane.f32.xlu2 %v1491_v52  ;;  %v1553_v18 = vadd.f32 %v1552_v16, %v1551_v14 }
0x18cf   : > { %v1460_v59 = vshrl.u32 %v1458_v55, 16  ;;  %v1459_v60 = vand.u32 65535, %v1458_v55  ;;  %v1512_v19 = vsel %vm362_vm1, %v1506_v15, -inf  ;;  %vm1612_vm1 = vcmp.eq.s32.totalorder %v1970_v40, 0 }
0x18d0   : > { %v1514_v20 = vmax.f32 %v1513_v17, %v1512_v19 }
0x18d1   : > { %v1462_v42 = vcvt.s32.f32 %v1460_v59  ;;  %v1461_v10 = vcvt.s32.f32 %v1459_v60 }
0x18d3   : > { %1465 = vadd.xlane.f32.xlu0 %v1462_v42  ;;  %1463 = vadd.xlane.f32.xlu1 %v1461_v10 }
0x18d6   : > { %1601 = vadd.xlane.f32.xlu2 %v1600_v11 }
0x18db   : > { %1515 = vmax.xlane.f32.xlu0 %v1514_v20  ;;  %1554 = vadd.xlane.f32.xlu1 %v1553_v18 }
0x1941   : > { %v1493_v21 = vpop.xlane.xlu2 %1492 }
0x1942   : > { %v1494_v22 = vrot.slane %v1493_v21, 4 }
0x1944   : > { %v1495_v39 = vadd.f32 %v1494_v22, %v1493_v21 }
0x1946   : > { %v1466_v24 = vpop.xlane.xlu0 %1465  ;;  %v1464_v36 = vpop.xlane.xlu1 %1463  ;;  %v1496_v27 = vrot.slane %v1495_v39, 2 }
0x1947   : > { %v1468_v33 = vcvt.f32.s32 %v1466_v24  ;;  %v1467_v25 = vcvt.f32.s32 %v1464_v36 }
0x1948   : > { %v1497_v38 = vadd.f32 %v1496_v27, %v1495_v39 }
0x1949   : > { %v1469_v23 = vshll.u32 %v1468_v33, 16  ;;  %v1602_v26 = vpop.xlane.xlu2 %1601 }
0x194a   : > { %v1603_v35 = vrot.slane %v1602_v26, 4  ;;  %v1498_v46 = vrot.slane %v1497_v38, 1 }
0x194b   : > { %v1470_v7 = vadd.s32 %v1469_v23, %v1467_v25 }
0x194c   : > { %v1604_v28 = vadd.f32 %v1603_v35, %v1602_v26  ;;  %v1499_v52 = vadd.f32 %v1498_v46, %v1497_v38 }
0x194d   : > { %v1471_v8 = vrot.slane %v1470_v7, 4 }
0x194e   : > { %v1605_v29 = vrot.slane %v1604_v28, 2  ;;  %v1516_v30 = vpop.xlane.xlu0 %1515  ;;  %v1555_v31 = vpop.xlane.xlu1 %1554 }
0x194f   : > { %v1472_v32 = vadd.s32 %v1471_v8, %v1470_v7  ;;  %v1517_v34 = vrot.slane %v1516_v30, 4  ;;  %v1556_v37 = vrot.slane %v1555_v31, 4 }
0x1950   : > { %v1606_v41 = vadd.f32 %v1605_v29, %v1604_v28 }
0x1951   : > { %v1518_v4 = vmax.f32 %v1516_v30, %v1517_v34  ;;  %v1557_v1 = vadd.f32 %v1556_v37, %v1555_v31  ;;  %v1473_v2 = vrot.slane %v1472_v32, 2 }
0x1952   : > { %v1607_v9 = vrot.slane %v1606_v41, 1 }
0x1953   : > { %v1519_v44 = vrot.slane %v1518_v4, 2  ;;  %v1558_v45 = vrot.slane %v1557_v1, 2  ;;  %v1474_v43 = vadd.s32 %v1473_v2, %v1472_v32 }
0x1954   : > { %v1608_v54 = vadd.f32 %v1607_v9, %v1606_v41 }
0x1955   : > { %v1520_v47 = vmax.f32 %v1518_v4, %v1519_v44  ;;  %v1559_v48 = vadd.f32 %v1558_v45, %v1557_v1  ;;  %v1475_v5 = vrot.slane %v1474_v43, 1 }
0x1957   : > { %v1476_v49 = vadd.s32 %v1475_v5, %v1474_v43  ;;  %v1521_v50 = vrot.slane %v1520_v47, 1  ;;  %v1560_v51 = vrot.slane %v1559_v48, 1 }
0x1959   : > { %1794 = vpush %v1476_v49  ;;  %v1522_v0 = vmax.f32 %v1520_v47, %v1521_v50  ;;  %v1561_v53 = vadd.f32 %v1560_v51, %v1559_v48 }
0x195a   : > { %1796 = vpush %v1499_v52 }
0x195b   : > { %1798 = vpush %v1522_v0 }
0x195c   : > { %1800 = vpush %v1561_v53 }
0x195d   : > { %1802 = vpush %v1608_v54 }
0x198a   : > { %s1795_s24 = spop %1794 }
0x198b   : > { %s1525_s8 = ssub.s32 %s2498_s27, %s1795_s24  ;;  %s1797_s9 = spop %1796 }
0x198c   : > { %s1526_s10 = scvt.s32.f32 %s1525_s8  ;;  %s1799_s11 = spop %1798 }
0x198d   : > { %s1801_s12 = spop %1800 }
0x198e   : > { %s1527_s13 = smul.f32 %s1799_s11, %s1526_s10  ;;  %s1803_s14 = spop %1802 }
0x198f   : > { %v1618_v55 = vstv %s1803_s14 }
0x1990   : > { %s2560_s13 = smov (!%p1524_p8, %s1527_s13), 0.0  ;;  %v1619_v56 = vsel %vm1613_vm0, %v1618_v55, %v1973_v3 }
0x1991   : > { %s1529_s17 = sadd.f32 %s1797_s9, %s2560_s13 }
0x1993   : > { %s1563_s19 = sadd.f32 %s1801_s12, %s1529_s17 }
0x1995   : > { %v1620_v57 = vstv %s1563_s19 }
0x1996   : > { %v1621_v58 = vsel %vm1612_vm1, %v1620_v57, %v1619_v56 }
0x1997   : > { %1622 = vst [vmem:[%s252_s23] sm:$0xff] %v1621_v58 }
0x1998 PF: > { %s14_s15 = sadd.s32 1, %s1835_s15  }
0x1999   : > { %p11_p9 = scmp.ge.s32.totalorder %s14_s15, 4  }
0x199b   :  { %13 = sbr.rel (!%p11_p9) target bundleno = 1 (0x1), region = 76 }

</bundles_post_ra>
